<compile_context>
chip_gen: v5e
topology: v5e:2x2
jax: 0.10.0
libtpu: 0.0.40
codegen_flags: <defaults>
</compile_context>

<pallas_src>
import jax
import jax.numpy as jnp
from jax.experimental import pallas as pl
from jax.experimental.pallas import tpu as pltpu

# --- small synthetic BERT config (bert-base-uncased scaled down) -------------
VOCAB = 100
HIDDEN = 32
HEADS = 2
HEAD_DIM = HIDDEN // HEADS
LAYERS = 2
INTER = 64
MAX_POS = 16
TYPE_VOCAB = 2
LN_EPS = 1e-12

W_KEYS = ["wqkv", "bqkv", "wo", "bo", "ln1g", "ln1b",
          "w1", "b1", "w2", "b2", "ln2g", "ln2b"]


def _layer_norm(v, g, b):
    mu = jnp.mean(v, axis=-1, keepdims=True)
    var = jnp.mean((v - mu) ** 2, axis=-1, keepdims=True)
    return (v - mu) * jax.lax.rsqrt(var + LN_EPS) * g + b


# ----------------------------- fused Pallas kernel ----------------------------
def bert_encoder_kernel(we_ref, te_ref, mask_ref, pe_ref, eg_ref, eb_ref,
                        wqkv_ref, bqkv_ref, wo_ref, bo_ref, ln1g_ref, ln1b_ref,
                        w1_ref, b1_ref, w2_ref, b2_ref, ln2g_ref, ln2b_ref,
                        out_ref, ctx_ref):
    bblk, S, H = out_ref.shape
    rows = bblk * S

    # --- BERT embeddings: word + position + token_type, then LayerNorm -------
    emb = we_ref[...] + te_ref[...] + pe_ref[...]                    # (bblk,S,H)
    # fold batch into the row dim: every dense matmul below is (rows, .)
    x = _layer_norm(emb, eg_ref[...], eb_ref[...]).reshape(rows, H)  # (rows,H)

    # extended attention mask: (1 - mask) * -10000  (BERT's additive key mask)
    neg = (1.0 - mask_ref[...]) * -10000.0                           # (bblk,1,S)

    # --- transformer layers (static unrolled; x stays resident on-chip) ------
    for l in range(LAYERS):
        # fused QKV projection: ONE (rows,H)x(H,3H) matmul.  1/sqrt(HEAD_DIM)
        # is already folded into the Q columns / bias at pack time.
        qkv = jnp.dot(x, wqkv_ref[l],
                      preferred_element_type=jnp.float32) + bqkv_ref[l]

        # attention: per batch element (unrolled), all heads batched per einsum
        for b in range(bblk):
            r0 = b * S
            q = jnp.stack([qkv[r0:r0 + S, h * HEAD_DIM:(h + 1) * HEAD_DIM]
                           for h in range(HEADS)])                    # (HEADS,S,HD)
            k = jnp.stack([qkv[r0:r0 + S, H + h * HEAD_DIM:H + (h + 1) * HEAD_DIM]
                           for h in range(HEADS)])
            v = jnp.stack([qkv[r0:r0 + S, 2 * H + h * HEAD_DIM:2 * H + (h + 1) * HEAD_DIM]
                           for h in range(HEADS)])

            s = jnp.einsum("hqd,hkd->hqk", q, k,
                           preferred_element_type=jnp.float32) + neg[b]
            s = s - jnp.max(s, axis=-1, keepdims=True)
            p = jnp.exp(s)
            p = p * pl.reciprocal(jnp.sum(p, axis=-1, keepdims=True), approx=True)

            ctx = jnp.einsum("hqk,hkd->hqd", p, v,
                             preferred_element_type=jnp.float32)       # (HEADS,S,HD)
            # assemble the (rows, H) context slab in VMEM scratch so the output
            # projection is a single dense matmul (no per-head matmuls / sums)
            for h in range(HEADS):
                ctx_ref[r0:r0 + S, h * HEAD_DIM:(h + 1) * HEAD_DIM] = ctx[h]

        # output projection: ONE (rows,H)x(H,H) matmul
        attn_out = jnp.dot(ctx_ref[...], wo_ref[l],
                           preferred_element_type=jnp.float32) + bo_ref[l]
        x1 = _layer_norm(x + attn_out, ln1g_ref[l], ln1b_ref[l])

        # FFN: two dense matmuls over all rows; tanh-GELU maps to a single EUP
        # op (use approximate=False only if bit-parity with PyTorch erf-GELU is
        # an acceptance criterion).
        h1 = jnp.dot(x1, w1_ref[l], preferred_element_type=jnp.float32) + b1_ref[l]
        h1 = jax.nn.gelu(h1, approximate=True)
        h2 = jnp.dot(h1, w2_ref[l], preferred_element_type=jnp.float32) + b2_ref[l]
        x = _layer_norm(x1 + h2, ln2g_ref[l], ln2b_ref[l])

    out_ref[...] = x.reshape(bblk, S, H)


# ------------------------------ wrapper ---------------------------------------
def run_encoder(we, te, mask3, pe, eg, eb, packed, bblk=None):
    B, S, H = we.shape
    if bblk is None:
        bblk = B            # fold the whole (toy) batch into one grid step
    nb = pl.cdiv(B, bblk)

    def batched(shape):
        nd = len(shape)
        return pl.BlockSpec((bblk,) + tuple(shape[1:]),
                            lambda i, _nd=nd: (i,) + (0,) * (_nd - 1))

    def const(a):
        nd = a.ndim
        return pl.BlockSpec(a.shape, lambda i, _nd=nd: (0,) * _nd)

    weights = [packed[k] for k in W_KEYS]
    in_specs = ([batched(we.shape), batched(te.shape), batched(mask3.shape),
                 const(pe), const(eg), const(eb)]
                + [const(w) for w in weights])

    return pl.pallas_call(
        bert_encoder_kernel,
        out_shape=jax.ShapeDtypeStruct((B, S, H), jnp.float32),
        grid=(nb,),
        in_specs=in_specs,
        out_specs=pl.BlockSpec((bblk, S, H), lambda i: (i, 0, 0)),
        scratch_shapes=[pltpu.VMEM((bblk * S, H), jnp.float32)],
        compiler_params=pltpu.CompilerParams(
            dimension_semantics=("arbitrary",)),
    )(we, te, mask3, pe, eg, eb, *weights)


# ------------------------------ parameters ------------------------------------
def init_params(key):
    def nrm(k, shape):
        return jax.random.normal(k, shape, jnp.float32) * 0.02

    keys = jax.random.split(key, 3 + LAYERS)
    params = {
        "word_emb": nrm(keys[0], (VOCAB, HIDDEN)),
        "pos_emb": nrm(keys[1], (MAX_POS, HIDDEN)),
        "type_emb": nrm(keys[2], (TYPE_VOCAB, HIDDEN)),
        "emb_ln_g": jnp.ones((1, HIDDEN), jnp.float32),
        "emb_ln_b": jnp.zeros((1, HIDDEN), jnp.float32),
        "layers": [],
    }
    for l in range(LAYERS):
        lk = jax.random.split(keys[3 + l], 6)
        lp = {
            # weights stored (in, out): y = x @ W + b  (== PyTorch x @ W.T + b)
            "wq": nrm(lk[0], (HIDDEN, HIDDEN)), "bq": jnp.zeros((1, HIDDEN), jnp.float32),
            "wk": nrm(lk[1], (HIDDEN, HIDDEN)), "bk": jnp.zeros((1, HIDDEN), jnp.float32),
            "wv": nrm(lk[2], (HIDDEN, HIDDEN)), "bv": jnp.zeros((1, HIDDEN), jnp.float32),
            "wo": nrm(lk[3], (HIDDEN, HIDDEN)), "bo": jnp.zeros((1, HIDDEN), jnp.float32),
            "ln1g": jnp.ones((1, HIDDEN), jnp.float32), "ln1b": jnp.zeros((1, HIDDEN), jnp.float32),
            "w1": nrm(lk[4], (HIDDEN, INTER)), "b1": jnp.zeros((1, INTER), jnp.float32),
            "w2": nrm(lk[5], (INTER, HIDDEN)), "b2": jnp.zeros((1, HIDDEN), jnp.float32),
            "ln2g": jnp.ones((1, HIDDEN), jnp.float32), "ln2b": jnp.zeros((1, HIDDEN), jnp.float32),
        }
        params["layers"].append(lp)
    return params


def pack_layer_params(layers):
    """One-time plain-JAX packing: fused [Q|K|V] weight with the softmax scale
    folded into the Q columns/bias; everything stacked along a leading layer
    axis (at real sizes this leading axis becomes a streamed grid dimension)."""
    scale = 1.0 / (HEAD_DIM ** 0.5)
    packed = {k: [] for k in W_KEYS}
    for lp in layers:
        packed["wqkv"].append(jnp.concatenate(
            [lp["wq"] * scale, lp["wk"], lp["wv"]], axis=1))        # (H, 3H)
        packed["bqkv"].append(jnp.concatenate(
            [lp["bq"] * scale, lp["bk"], lp["bv"]], axis=1))        # (1, 3H)
        packed["wo"].append(lp["wo"])                               # (H, H)
        for k in ["bo", "ln1g", "ln1b", "w1", "b1", "w2", "b2", "ln2g", "ln2b"]:
            packed[k].append(lp[k])
    return {k: jnp.stack(v) for k, v in packed.items()}             # (L, ...)


# ------------------------------ forward ----------------------------------------
def bert_text_encoder_forward(text, params, packed=None):
    """text: (B, 3, S) — [input_ids, attention_mask, token_type_ids] like the
    PyTorch module. Returns last_hidden_states (B, S, HIDDEN)."""
    input_ids = text[:, 0, :].astype(jnp.int32)
    input_mask = text[:, 1, :].astype(jnp.float32)
    segment_ids = text[:, 2, :].astype(jnp.int32)
    B, S = input_ids.shape

    # embedding-table gathers (glue); sum + LayerNorm happens inside the kernel
    we = jnp.take(params["word_emb"], input_ids, axis=0)
    te = jnp.take(params["type_emb"], segment_ids, axis=0)
    pe = params["pos_emb"][:S]                      # (S, H): shared, not broadcast
    mask3 = input_mask.reshape(B, 1, S)

    if packed is None:
        packed = pack_layer_params(params["layers"])

    # TODO(synk): tokenizer / pretrained-checkpoint loading have no Pallas
    # equivalent; weights are deterministic synthetic init. Dropout is a no-op
    # in the no_grad/eval path and is omitted.
    return run_encoder(we, te, mask3, pe, params["emb_ln_g"], params["emb_ln_b"], packed)


if __name__ == "__main__":
    B, S = 2, 8
    key = jax.random.PRNGKey(0)
    k_ids, k_seg, k_par = jax.random.split(key, 3)

    ids = jax.random.randint(k_ids, (B, S), 0, VOCAB)
    segs = jax.random.randint(k_seg, (B, S), 0, TYPE_VOCAB)
    mask = jnp.ones((B, S), jnp.float32).at[1, 6:].set(0.0)   # ragged second sequence
    text = jnp.stack([ids.astype(jnp.float32), mask, segs.astype(jnp.float32)], axis=1)

    params = init_params(k_par)
    out = bert_text_encoder_forward(text, params)
    jax.block_until_ready(out)
    assert out.shape == (B, S, HIDDEN) and out.dtype == jnp.float32
    assert bool(jnp.all(jnp.isfinite(out)))
    print("KERNEL_OK")
</pallas_src>

<mosaic_0001>
module attributes {stable_mosaic.version = 11 : i64} {
  func.func @bert_encoder_kernel(%arg0: i32, %arg1: memref<2x8x32xf32, #tpu.memory_space<vmem>>, %arg2: memref<2x8x32xf32, #tpu.memory_space<vmem>>, %arg3: memref<2x1x8xf32, #tpu.memory_space<vmem>>, %arg4: memref<8x32xf32, #tpu.memory_space<vmem>>, %arg5: memref<1x32xf32, #tpu.memory_space<vmem>>, %arg6: memref<1x32xf32, #tpu.memory_space<vmem>>, %arg7: memref<2x32x96xf32, #tpu.memory_space<vmem>>, %arg8: memref<2x1x96xf32, #tpu.memory_space<vmem>>, %arg9: memref<2x32x32xf32, #tpu.memory_space<vmem>>, %arg10: memref<2x1x32xf32, #tpu.memory_space<vmem>>, %arg11: memref<2x1x32xf32, #tpu.memory_space<vmem>>, %arg12: memref<2x1x32xf32, #tpu.memory_space<vmem>>, %arg13: memref<2x32x64xf32, #tpu.memory_space<vmem>>, %arg14: memref<2x1x64xf32, #tpu.memory_space<vmem>>, %arg15: memref<2x64x32xf32, #tpu.memory_space<vmem>>, %arg16: memref<2x1x32xf32, #tpu.memory_space<vmem>>, %arg17: memref<2x1x32xf32, #tpu.memory_space<vmem>>, %arg18: memref<2x1x32xf32, #tpu.memory_space<vmem>>, %arg19: memref<2x8x32xf32, #tpu.memory_space<vmem>>, %arg20: memref<16x32xf32, #tpu.memory_space<vmem>>) attributes {dimension_semantics = [#tpu.dimension_semantics<arbitrary>], iteration_bounds = array<i64: 1>, scalar_prefetch = 0 : i64, scratch_operands = 1 : i64, tpu.core_type = #tpu.core_type<tc>, window_params = [{transform_indices = @transform_0, window_bounds = array<i64: 2, 8, 32>}, {transform_indices = @transform_1, window_bounds = array<i64: 2, 8, 32>}, {transform_indices = @transform_2, window_bounds = array<i64: 2, 1, 8>}, {pipeline_mode = #tpu.pipeline_mode<synchronous>, transform_indices = @transform_3, window_bounds = array<i64: 8, 32>}, {pipeline_mode = #tpu.pipeline_mode<synchronous>, transform_indices = @transform_4, window_bounds = array<i64: 1, 32>}, {pipeline_mode = #tpu.pipeline_mode<synchronous>, transform_indices = @transform_5, window_bounds = array<i64: 1, 32>}, {pipeline_mode = #tpu.pipeline_mode<synchronous>, transform_indices = @transform_6, window_bounds = array<i64: 2, 32, 96>}, {pipeline_mode = #tpu.pipeline_mode<synchronous>, transform_indices = @transform_7, window_bounds = array<i64: 2, 1, 96>}, {pipeline_mode = #tpu.pipeline_mode<synchronous>, transform_indices = @transform_8, window_bounds = array<i64: 2, 32, 32>}, {pipeline_mode = #tpu.pipeline_mode<synchronous>, transform_indices = @transform_9, window_bounds = array<i64: 2, 1, 32>}, {pipeline_mode = #tpu.pipeline_mode<synchronous>, transform_indices = @transform_10, window_bounds = array<i64: 2, 1, 32>}, {pipeline_mode = #tpu.pipeline_mode<synchronous>, transform_indices = @transform_11, window_bounds = array<i64: 2, 1, 32>}, {pipeline_mode = #tpu.pipeline_mode<synchronous>, transform_indices = @transform_12, window_bounds = array<i64: 2, 32, 64>}, {pipeline_mode = #tpu.pipeline_mode<synchronous>, transform_indices = @transform_13, window_bounds = array<i64: 2, 1, 64>}, {pipeline_mode = #tpu.pipeline_mode<synchronous>, transform_indices = @transform_14, window_bounds = array<i64: 2, 64, 32>}, {pipeline_mode = #tpu.pipeline_mode<synchronous>, transform_indices = @transform_15, window_bounds = array<i64: 2, 1, 32>}, {pipeline_mode = #tpu.pipeline_mode<synchronous>, transform_indices = @transform_16, window_bounds = array<i64: 2, 1, 32>}, {pipeline_mode = #tpu.pipeline_mode<synchronous>, transform_indices = @transform_17, window_bounds = array<i64: 2, 1, 32>}, {transform_indices = @transform_18, window_bounds = array<i64: 2, 8, 32>}]} {
    %c0 = arith.constant 0 : index
    %c0_0 = arith.constant 0 : index
    %c0_1 = arith.constant 0 : index
    %0 = vector.load %arg1[%c0, %c0_0, %c0_1] : memref<2x8x32xf32, #tpu.memory_space<vmem>>, vector<2x8x32xf32>
    %c0_2 = arith.constant 0 : index
    %c0_3 = arith.constant 0 : index
    %c0_4 = arith.constant 0 : index
    %1 = vector.load %arg2[%c0_2, %c0_3, %c0_4] : memref<2x8x32xf32, #tpu.memory_space<vmem>>, vector<2x8x32xf32>
    %2 = arith.addf %0, %1 : vector<2x8x32xf32>
    %c0_5 = arith.constant 0 : index
    %c0_6 = arith.constant 0 : index
    %3 = vector.load %arg4[%c0_5, %c0_6] : memref<8x32xf32, #tpu.memory_space<vmem>>, vector<8x32xf32>
    %4 = vector.shape_cast %3 : vector<8x32xf32> to vector<1x8x32xf32>
    %5 = vector.broadcast %4 : vector<1x8x32xf32> to vector<2x8x32xf32>
    %6 = arith.addf %2, %5 : vector<2x8x32xf32>
    %c0_7 = arith.constant 0 : index
    %c0_8 = arith.constant 0 : index
    %7 = vector.load %arg5[%c0_7, %c0_8] : memref<1x32xf32, #tpu.memory_space<vmem>>, vector<1x32xf32>
    %c0_9 = arith.constant 0 : index
    %c0_10 = arith.constant 0 : index
    %8 = vector.load %arg6[%c0_9, %c0_10] : memref<1x32xf32, #tpu.memory_space<vmem>>, vector<1x32xf32>
    %cst = arith.constant dense<0.000000e+00> : vector<2x8xf32>
    %9 = vector.multi_reduction <add>, %6, %cst [2] : vector<2x8x32xf32> to vector<2x8xf32>
    %10 = vector.shape_cast %9 : vector<2x8xf32> to vector<2x8x1xf32>
    %cst_11 = arith.constant 3.200000e+01 : f32
    %11 = vector.broadcast %cst_11 : f32 to vector<2x8x1xf32>
    %12 = arith.divf %10, %11 : vector<2x8x1xf32>
    %13 = vector.broadcast %12 : vector<2x8x1xf32> to vector<2x8x32xf32>
    %14 = arith.subf %6, %13 : vector<2x8x32xf32>
    %15 = arith.mulf %14, %14 : vector<2x8x32xf32>
    %cst_12 = arith.constant dense<0.000000e+00> : vector<2x8xf32>
    %16 = vector.multi_reduction <add>, %15, %cst_12 [2] : vector<2x8x32xf32> to vector<2x8xf32>
    %17 = vector.shape_cast %16 : vector<2x8xf32> to vector<2x8x1xf32>
    %cst_13 = arith.constant 3.200000e+01 : f32
    %18 = vector.broadcast %cst_13 : f32 to vector<2x8x1xf32>
    %19 = arith.divf %17, %18 : vector<2x8x1xf32>
    %20 = vector.broadcast %12 : vector<2x8x1xf32> to vector<2x8x32xf32>
    %21 = arith.subf %6, %20 : vector<2x8x32xf32>
    %cst_14 = arith.constant 9.99999996E-13 : f32
    %22 = vector.broadcast %cst_14 : f32 to vector<2x8x1xf32>
    %23 = arith.addf %19, %22 : vector<2x8x1xf32>
    %24 = math.rsqrt %23 : vector<2x8x1xf32>
    %25 = vector.broadcast %24 : vector<2x8x1xf32> to vector<2x8x32xf32>
    %26 = arith.mulf %21, %25 : vector<2x8x32xf32>
    %27 = vector.shape_cast %7 : vector<1x32xf32> to vector<1x1x32xf32>
    %28 = vector.broadcast %27 : vector<1x1x32xf32> to vector<2x8x32xf32>
    %29 = arith.mulf %26, %28 : vector<2x8x32xf32>
    %30 = vector.shape_cast %8 : vector<1x32xf32> to vector<1x1x32xf32>
    %31 = vector.broadcast %30 : vector<1x1x32xf32> to vector<2x8x32xf32>
    %32 = arith.addf %29, %31 : vector<2x8x32xf32>
    %33 = vector.shape_cast %32 : vector<2x8x32xf32> to vector<16x32xf32>
    %c0_15 = arith.constant 0 : index
    %c0_16 = arith.constant 0 : index
    %c0_17 = arith.constant 0 : index
    %34 = vector.load %arg3[%c0_15, %c0_16, %c0_17] : memref<2x1x8xf32, #tpu.memory_space<vmem>>, vector<2x1x8xf32>
    %cst_18 = arith.constant 1.000000e+00 : f32
    %35 = vector.broadcast %cst_18 : f32 to vector<2x1x8xf32>
    %36 = arith.subf %35, %34 : vector<2x1x8xf32>
    %cst_19 = arith.constant -1.000000e+04 : f32
    %37 = vector.broadcast %cst_19 : f32 to vector<2x1x8xf32>
    %38 = arith.mulf %36, %37 : vector<2x1x8xf32>
    %c0_20 = arith.constant 0 : index
    %c0_21 = arith.constant 0 : index
    %c0_22 = arith.constant 0 : index
    %39 = vector.load %arg7[%c0_20, %c0_21, %c0_22] : memref<2x32x96xf32, #tpu.memory_space<vmem>>, vector<1x32x96xf32>
    %40 = vector.shape_cast %39 : vector<1x32x96xf32> to vector<32x96xf32>
    %cst_23 = arith.constant dense<0.000000e+00> : vector<16x96xf32>
    %41 = tpu.matmul %33, %40, %cst_23 {dimension_numbers = #tpu.dot_dimension_numbers<[1], [0], [0], [1], [0, 0, 1, 1], [], []>} : vector<16x32xf32>, vector<32x96xf32>, vector<16x96xf32> -> vector<16x96xf32>
    %c0_24 = arith.constant 0 : index
    %c0_25 = arith.constant 0 : index
    %c0_26 = arith.constant 0 : index
    %42 = vector.load %arg8[%c0_24, %c0_25, %c0_26] : memref<2x1x96xf32, #tpu.memory_space<vmem>>, vector<1x1x96xf32>
    %43 = vector.shape_cast %42 : vector<1x1x96xf32> to vector<1x96xf32>
    %44 = vector.broadcast %43 : vector<1x96xf32> to vector<16x96xf32>
    %45 = arith.addf %41, %44 : vector<16x96xf32>
    %46 = vector.extract_strided_slice %45 {offsets = [0, 0], sizes = [8, 16], strides = [1, 1]} : vector<16x96xf32> to vector<8x16xf32>
    %47 = vector.extract_strided_slice %45 {offsets = [0, 16], sizes = [8, 16], strides = [1, 1]} : vector<16x96xf32> to vector<8x16xf32>
    %48 = vector.shape_cast %46 : vector<8x16xf32> to vector<1x8x16xf32>
    %49 = vector.shape_cast %47 : vector<8x16xf32> to vector<1x8x16xf32>
    %50 = tpu.concatenate %48, %49 in 0 : vector<1x8x16xf32>, vector<1x8x16xf32> -> vector<2x8x16xf32>
    %51 = vector.extract_strided_slice %45 {offsets = [0, 32], sizes = [8, 16], strides = [1, 1]} : vector<16x96xf32> to vector<8x16xf32>
    %52 = vector.extract_strided_slice %45 {offsets = [0, 48], sizes = [8, 16], strides = [1, 1]} : vector<16x96xf32> to vector<8x16xf32>
    %53 = vector.shape_cast %51 : vector<8x16xf32> to vector<1x8x16xf32>
    %54 = vector.shape_cast %52 : vector<8x16xf32> to vector<1x8x16xf32>
    %55 = tpu.concatenate %53, %54 in 0 : vector<1x8x16xf32>, vector<1x8x16xf32> -> vector<2x8x16xf32>
    %56 = vector.extract_strided_slice %45 {offsets = [0, 64], sizes = [8, 16], strides = [1, 1]} : vector<16x96xf32> to vector<8x16xf32>
    %57 = vector.extract_strided_slice %45 {offsets = [0, 80], sizes = [8, 16], strides = [1, 1]} : vector<16x96xf32> to vector<8x16xf32>
    %58 = vector.shape_cast %56 : vector<8x16xf32> to vector<1x8x16xf32>
    %59 = vector.shape_cast %57 : vector<8x16xf32> to vector<1x8x16xf32>
    %60 = tpu.concatenate %58, %59 in 0 : vector<1x8x16xf32>, vector<1x8x16xf32> -> vector<2x8x16xf32>
    "tpu.trace_start"() <{level = 10 : i32, message = "hqd,hkd->hqk"}> : () -> ()
    %cst_27 = arith.constant dense<0.000000e+00> : vector<2x8x8xf32>
    %61 = tpu.matmul %50, %55, %cst_27 {dimension_numbers = #tpu.dot_dimension_numbers<[2], [2], [1], [1], [0, 0, 0, 1, 1, 1], [0], [0]>} : vector<2x8x16xf32>, vector<2x8x16xf32>, vector<2x8x8xf32> -> vector<2x8x8xf32>
    "tpu.trace_stop"() : () -> ()
    %62 = vector.extract_strided_slice %38 {offsets = [0, 0, 0], sizes = [1, 1, 8], strides = [1, 1, 1]} : vector<2x1x8xf32> to vector<1x1x8xf32>
    %63 = vector.shape_cast %62 : vector<1x1x8xf32> to vector<1x8xf32>
    %64 = vector.shape_cast %63 : vector<1x8xf32> to vector<1x1x8xf32>
    %65 = vector.broadcast %64 : vector<1x1x8xf32> to vector<2x8x8xf32>
    %66 = arith.addf %61, %65 : vector<2x8x8xf32>
    %cst_28 = arith.constant dense<0xFF800000> : vector<2x8xf32>
    %67 = vector.multi_reduction <maximumf>, %66, %cst_28 [2] : vector<2x8x8xf32> to vector<2x8xf32>
    %68 = vector.shape_cast %67 : vector<2x8xf32> to vector<2x8x1xf32>
    %69 = vector.broadcast %68 : vector<2x8x1xf32> to vector<2x8x8xf32>
    %70 = arith.subf %66, %69 : vector<2x8x8xf32>
    %71 = math.exp %70 : vector<2x8x8xf32>
    %cst_29 = arith.constant dense<0.000000e+00> : vector<2x8xf32>
    %72 = vector.multi_reduction <add>, %71, %cst_29 [2] : vector<2x8x8xf32> to vector<2x8xf32>
    %73 = vector.shape_cast %72 : vector<2x8xf32> to vector<2x8x1xf32>
    %74 = tpu.reciprocal %73 {approx = true} : vector<2x8x1xf32> -> vector<2x8x1xf32>
    %75 = vector.broadcast %74 : vector<2x8x1xf32> to vector<2x8x8xf32>
    %76 = arith.mulf %71, %75 : vector<2x8x8xf32>
    "tpu.trace_start"() <{level = 10 : i32, message = "hqk,hkd->hqd"}> : () -> ()
    %cst_30 = arith.constant dense<0.000000e+00> : vector<2x8x16xf32>
    %77 = tpu.matmul %76, %60, %cst_30 {dimension_numbers = #tpu.dot_dimension_numbers<[2], [1], [1], [2], [0, 0, 0, 1, 1, 2], [0], [0]>} : vector<2x8x8xf32>, vector<2x8x16xf32>, vector<2x8x16xf32> -> vector<2x8x16xf32>
    "tpu.trace_stop"() : () -> ()
    %78 = vector.extract_strided_slice %77 {offsets = [0, 0, 0], sizes = [1, 8, 16], strides = [1, 1, 1]} : vector<2x8x16xf32> to vector<1x8x16xf32>
    %79 = vector.shape_cast %78 : vector<1x8x16xf32> to vector<8x16xf32>
    %c0_31 = arith.constant 0 : index
    %c0_32 = arith.constant 0 : index
    %80 = vector.load %arg20[%c0_31, %c0_32] : memref<16x32xf32, #tpu.memory_space<vmem>>, vector<8x16xf32>
    tpu.vector_store %arg20[%c0_31, %c0_32], %79 {strides = array<i32>} : memref<16x32xf32, #tpu.memory_space<vmem>>, vector<8x16xf32>,
    %81 = vector.extract_strided_slice %77 {offsets = [1, 0, 0], sizes = [1, 8, 16], strides = [1, 1, 1]} : vector<2x8x16xf32> to vector<1x8x16xf32>
    %82 = vector.shape_cast %81 : vector<1x8x16xf32> to vector<8x16xf32>
    %c0_33 = arith.constant 0 : index
    %c16 = arith.constant 16 : index
    %83 = vector.load %arg20[%c0_33, %c16] : memref<16x32xf32, #tpu.memory_space<vmem>>, vector<8x16xf32>
    tpu.vector_store %arg20[%c0_33, %c16], %82 {strides = array<i32>} : memref<16x32xf32, #tpu.memory_space<vmem>>, vector<8x16xf32>,
    %84 = vector.extract_strided_slice %45 {offsets = [8, 0], sizes = [8, 16], strides = [1, 1]} : vector<16x96xf32> to vector<8x16xf32>
    %85 = vector.extract_strided_slice %45 {offsets = [8, 16], sizes = [8, 16], strides = [1, 1]} : vector<16x96xf32> to vector<8x16xf32>
    %86 = vector.shape_cast %84 : vector<8x16xf32> to vector<1x8x16xf32>
    %87 = vector.shape_cast %85 : vector<8x16xf32> to vector<1x8x16xf32>
    %88 = tpu.concatenate %86, %87 in 0 : vector<1x8x16xf32>, vector<1x8x16xf32> -> vector<2x8x16xf32>
    %89 = vector.extract_strided_slice %45 {offsets = [8, 32], sizes = [8, 16], strides = [1, 1]} : vector<16x96xf32> to vector<8x16xf32>
    %90 = vector.extract_strided_slice %45 {offsets = [8, 48], sizes = [8, 16], strides = [1, 1]} : vector<16x96xf32> to vector<8x16xf32>
    %91 = vector.shape_cast %89 : vector<8x16xf32> to vector<1x8x16xf32>
    %92 = vector.shape_cast %90 : vector<8x16xf32> to vector<1x8x16xf32>
    %93 = tpu.concatenate %91, %92 in 0 : vector<1x8x16xf32>, vector<1x8x16xf32> -> vector<2x8x16xf32>
    %94 = vector.extract_strided_slice %45 {offsets = [8, 64], sizes = [8, 16], strides = [1, 1]} : vector<16x96xf32> to vector<8x16xf32>
    %95 = vector.extract_strided_slice %45 {offsets = [8, 80], sizes = [8, 16], strides = [1, 1]} : vector<16x96xf32> to vector<8x16xf32>
    %96 = vector.shape_cast %94 : vector<8x16xf32> to vector<1x8x16xf32>
    %97 = vector.shape_cast %95 : vector<8x16xf32> to vector<1x8x16xf32>
    %98 = tpu.concatenate %96, %97 in 0 : vector<1x8x16xf32>, vector<1x8x16xf32> -> vector<2x8x16xf32>
    "tpu.trace_start"() <{level = 10 : i32, message = "hqd,hkd->hqk"}> : () -> ()
    %cst_34 = arith.constant dense<0.000000e+00> : vector<2x8x8xf32>
    %99 = tpu.matmul %88, %93, %cst_34 {dimension_numbers = #tpu.dot_dimension_numbers<[2], [2], [1], [1], [0, 0, 0, 1, 1, 1], [0], [0]>} : vector<2x8x16xf32>, vector<2x8x16xf32>, vector<2x8x8xf32> -> vector<2x8x8xf32>
    "tpu.trace_stop"() : () -> ()
    %100 = vector.extract_strided_slice %38 {offsets = [1, 0, 0], sizes = [1, 1, 8], strides = [1, 1, 1]} : vector<2x1x8xf32> to vector<1x1x8xf32>
    %101 = vector.shape_cast %100 : vector<1x1x8xf32> to vector<1x8xf32>
    %102 = vector.shape_cast %101 : vector<1x8xf32> to vector<1x1x8xf32>
    %103 = vector.broadcast %102 : vector<1x1x8xf32> to vector<2x8x8xf32>
    %104 = arith.addf %99, %103 : vector<2x8x8xf32>
    %cst_35 = arith.constant dense<0xFF800000> : vector<2x8xf32>
    %105 = vector.multi_reduction <maximumf>, %104, %cst_35 [2] : vector<2x8x8xf32> to vector<2x8xf32>
    %106 = vector.shape_cast %105 : vector<2x8xf32> to vector<2x8x1xf32>
    %107 = vector.broadcast %106 : vector<2x8x1xf32> to vector<2x8x8xf32>
    %108 = arith.subf %104, %107 : vector<2x8x8xf32>
    %109 = math.exp %108 : vector<2x8x8xf32>
    %cst_36 = arith.constant dense<0.000000e+00> : vector<2x8xf32>
    %110 = vector.multi_reduction <add>, %109, %cst_36 [2] : vector<2x8x8xf32> to vector<2x8xf32>
    %111 = vector.shape_cast %110 : vector<2x8xf32> to vector<2x8x1xf32>
    %112 = tpu.reciprocal %111 {approx = true} : vector<2x8x1xf32> -> vector<2x8x1xf32>
    %113 = vector.broadcast %112 : vector<2x8x1xf32> to vector<2x8x8xf32>
    %114 = arith.mulf %109, %113 : vector<2x8x8xf32>
    "tpu.trace_start"() <{level = 10 : i32, message = "hqk,hkd->hqd"}> : () -> ()
    %cst_37 = arith.constant dense<0.000000e+00> : vector<2x8x16xf32>
    %115 = tpu.matmul %114, %98, %cst_37 {dimension_numbers = #tpu.dot_dimension_numbers<[2], [1], [1], [2], [0, 0, 0, 1, 1, 2], [0], [0]>} : vector<2x8x8xf32>, vector<2x8x16xf32>, vector<2x8x16xf32> -> vector<2x8x16xf32>
    "tpu.trace_stop"() : () -> ()
    %116 = vector.extract_strided_slice %115 {offsets = [0, 0, 0], sizes = [1, 8, 16], strides = [1, 1, 1]} : vector<2x8x16xf32> to vector<1x8x16xf32>
    %117 = vector.shape_cast %116 : vector<1x8x16xf32> to vector<8x16xf32>
    %c8 = arith.constant 8 : index
    %c0_38 = arith.constant 0 : index
    %118 = vector.load %arg20[%c8, %c0_38] : memref<16x32xf32, #tpu.memory_space<vmem>>, vector<8x16xf32>
    tpu.vector_store %arg20[%c8, %c0_38], %117 {strides = array<i32>} : memref<16x32xf32, #tpu.memory_space<vmem>>, vector<8x16xf32>,
    %119 = vector.extract_strided_slice %115 {offsets = [1, 0, 0], sizes = [1, 8, 16], strides = [1, 1, 1]} : vector<2x8x16xf32> to vector<1x8x16xf32>
    %120 = vector.shape_cast %119 : vector<1x8x16xf32> to vector<8x16xf32>
    %c8_39 = arith.constant 8 : index
    %c16_40 = arith.constant 16 : index
    %121 = vector.load %arg20[%c8_39, %c16_40] : memref<16x32xf32, #tpu.memory_space<vmem>>, vector<8x16xf32>
    tpu.vector_store %arg20[%c8_39, %c16_40], %120 {strides = array<i32>} : memref<16x32xf32, #tpu.memory_space<vmem>>, vector<8x16xf32>,
    %c0_41 = arith.constant 0 : index
    %c0_42 = arith.constant 0 : index
    %122 = vector.load %arg20[%c0_41, %c0_42] : memref<16x32xf32, #tpu.memory_space<vmem>>, vector<16x32xf32>
    %c0_43 = arith.constant 0 : index
    %c0_44 = arith.constant 0 : index
    %c0_45 = arith.constant 0 : index
    %123 = vector.load %arg9[%c0_43, %c0_44, %c0_45] : memref<2x32x32xf32, #tpu.memory_space<vmem>>, vector<1x32x32xf32>
    %124 = vector.shape_cast %123 : vector<1x32x32xf32> to vector<32x32xf32>
    %cst_46 = arith.constant dense<0.000000e+00> : vector<16x32xf32>
    %125 = tpu.matmul %122, %124, %cst_46 {dimension_numbers = #tpu.dot_dimension_numbers<[1], [0], [0], [1], [0, 0, 1, 1], [], []>} : vector<16x32xf32>, vector<32x32xf32>, vector<16x32xf32> -> vector<16x32xf32>
    %c0_47 = arith.constant 0 : index
    %c0_48 = arith.constant 0 : index
    %c0_49 = arith.constant 0 : index
    %126 = vector.load %arg10[%c0_47, %c0_48, %c0_49] : memref<2x1x32xf32, #tpu.memory_space<vmem>>, vector<1x1x32xf32>
    %127 = vector.shape_cast %126 : vector<1x1x32xf32> to vector<1x32xf32>
    %128 = vector.broadcast %127 : vector<1x32xf32> to vector<16x32xf32>
    %129 = arith.addf %125, %128 : vector<16x32xf32>
    %130 = arith.addf %33, %129 : vector<16x32xf32>
    %c0_50 = arith.constant 0 : index
    %c0_51 = arith.constant 0 : index
    %c0_52 = arith.constant 0 : index
    %131 = vector.load %arg11[%c0_50, %c0_51, %c0_52] : memref<2x1x32xf32, #tpu.memory_space<vmem>>, vector<1x1x32xf32>
    %132 = vector.shape_cast %131 : vector<1x1x32xf32> to vector<1x32xf32>
    %c0_53 = arith.constant 0 : index
    %c0_54 = arith.constant 0 : index
    %c0_55 = arith.constant 0 : index
    %133 = vector.load %arg12[%c0_53, %c0_54, %c0_55] : memref<2x1x32xf32, #tpu.memory_space<vmem>>, vector<1x1x32xf32>
    %134 = vector.shape_cast %133 : vector<1x1x32xf32> to vector<1x32xf32>
    %cst_56 = arith.constant dense<0.000000e+00> : vector<16xf32>
    %135 = vector.multi_reduction <add>, %130, %cst_56 [1] : vector<16x32xf32> to vector<16xf32>
    %136 = vector.shape_cast %135 : vector<16xf32> to vector<16x1xf32>
    %cst_57 = arith.constant 3.200000e+01 : f32
    %137 = vector.broadcast %cst_57 : f32 to vector<16x1xf32>
    %138 = arith.divf %136, %137 : vector<16x1xf32>
    %139 = vector.broadcast %138 : vector<16x1xf32> to vector<16x32xf32>
    %140 = arith.subf %130, %139 : vector<16x32xf32>
    %141 = arith.mulf %140, %140 : vector<16x32xf32>
    %cst_58 = arith.constant dense<0.000000e+00> : vector<16xf32>
    %142 = vector.multi_reduction <add>, %141, %cst_58 [1] : vector<16x32xf32> to vector<16xf32>
    %143 = vector.shape_cast %142 : vector<16xf32> to vector<16x1xf32>
    %cst_59 = arith.constant 3.200000e+01 : f32
    %144 = vector.broadcast %cst_59 : f32 to vector<16x1xf32>
    %145 = arith.divf %143, %144 : vector<16x1xf32>
    %146 = vector.broadcast %138 : vector<16x1xf32> to vector<16x32xf32>
    %147 = arith.subf %130, %146 : vector<16x32xf32>
    %cst_60 = arith.constant 9.99999996E-13 : f32
    %148 = vector.broadcast %cst_60 : f32 to vector<16x1xf32>
    %149 = arith.addf %145, %148 : vector<16x1xf32>
    %150 = math.rsqrt %149 : vector<16x1xf32>
    %151 = vector.broadcast %150 : vector<16x1xf32> to vector<16x32xf32>
    %152 = arith.mulf %147, %151 : vector<16x32xf32>
    %153 = vector.broadcast %132 : vector<1x32xf32> to vector<16x32xf32>
    %154 = arith.mulf %152, %153 : vector<16x32xf32>
    %155 = vector.broadcast %134 : vector<1x32xf32> to vector<16x32xf32>
    %156 = arith.addf %154, %155 : vector<16x32xf32>
    %c0_61 = arith.constant 0 : index
    %c0_62 = arith.constant 0 : index
    %c0_63 = arith.constant 0 : index
    %157 = vector.load %arg13[%c0_61, %c0_62, %c0_63] : memref<2x32x64xf32, #tpu.memory_space<vmem>>, vector<1x32x64xf32>
    %158 = vector.shape_cast %157 : vector<1x32x64xf32> to vector<32x64xf32>
    %cst_64 = arith.constant dense<0.000000e+00> : vector<16x64xf32>
    %159 = tpu.matmul %156, %158, %cst_64 {dimension_numbers = #tpu.dot_dimension_numbers<[1], [0], [0], [1], [0, 0, 1, 1], [], []>} : vector<16x32xf32>, vector<32x64xf32>, vector<16x64xf32> -> vector<16x64xf32>
    %c0_65 = arith.constant 0 : index
    %c0_66 = arith.constant 0 : index
    %c0_67 = arith.constant 0 : index
    %160 = vector.load %arg14[%c0_65, %c0_66, %c0_67] : memref<2x1x64xf32, #tpu.memory_space<vmem>>, vector<1x1x64xf32>
    %161 = vector.shape_cast %160 : vector<1x1x64xf32> to vector<1x64xf32>
    %162 = vector.broadcast %161 : vector<1x64xf32> to vector<16x64xf32>
    %163 = arith.addf %159, %162 : vector<16x64xf32>
    %164 = arith.mulf %163, %163 : vector<16x64xf32>
    %165 = arith.mulf %163, %164 : vector<16x64xf32>
    %cst_68 = arith.constant 4.471500e-02 : f32
    %166 = vector.broadcast %cst_68 : f32 to vector<16x64xf32>
    %167 = arith.mulf %166, %165 : vector<16x64xf32>
    %168 = arith.addf %163, %167 : vector<16x64xf32>
    %cst_69 = arith.constant 0.797884583 : f32
    %169 = vector.broadcast %cst_69 : f32 to vector<16x64xf32>
    %170 = arith.mulf %169, %168 : vector<16x64xf32>
    %171 = math.tanh %170 : vector<16x64xf32>
    %cst_70 = arith.constant 1.000000e+00 : f32
    %172 = vector.broadcast %cst_70 : f32 to vector<16x64xf32>
    %173 = arith.addf %172, %171 : vector<16x64xf32>
    %cst_71 = arith.constant 5.000000e-01 : f32
    %174 = vector.broadcast %cst_71 : f32 to vector<16x64xf32>
    %175 = arith.mulf %174, %173 : vector<16x64xf32>
    %176 = arith.mulf %163, %175 : vector<16x64xf32>
    %c0_72 = arith.constant 0 : index
    %c0_73 = arith.constant 0 : index
    %c0_74 = arith.constant 0 : index
    %177 = vector.load %arg15[%c0_72, %c0_73, %c0_74] : memref<2x64x32xf32, #tpu.memory_space<vmem>>, vector<1x64x32xf32>
    %178 = vector.shape_cast %177 : vector<1x64x32xf32> to vector<64x32xf32>
    %cst_75 = arith.constant dense<0.000000e+00> : vector<16x32xf32>
    %179 = tpu.matmul %176, %178, %cst_75 {dimension_numbers = #tpu.dot_dimension_numbers<[1], [0], [0], [1], [0, 0, 1, 1], [], []>} : vector<16x64xf32>, vector<64x32xf32>, vector<16x32xf32> -> vector<16x32xf32>
    %c0_76 = arith.constant 0 : index
    %c0_77 = arith.constant 0 : index
    %c0_78 = arith.constant 0 : index
    %180 = vector.load %arg16[%c0_76, %c0_77, %c0_78] : memref<2x1x32xf32, #tpu.memory_space<vmem>>, vector<1x1x32xf32>
    %181 = vector.shape_cast %180 : vector<1x1x32xf32> to vector<1x32xf32>
    %182 = vector.broadcast %181 : vector<1x32xf32> to vector<16x32xf32>
    %183 = arith.addf %179, %182 : vector<16x32xf32>
    %184 = arith.addf %156, %183 : vector<16x32xf32>
    %c0_79 = arith.constant 0 : index
    %c0_80 = arith.constant 0 : index
    %c0_81 = arith.constant 0 : index
    %185 = vector.load %arg17[%c0_79, %c0_80, %c0_81] : memref<2x1x32xf32, #tpu.memory_space<vmem>>, vector<1x1x32xf32>
    %186 = vector.shape_cast %185 : vector<1x1x32xf32> to vector<1x32xf32>
    %c0_82 = arith.constant 0 : index
    %c0_83 = arith.constant 0 : index
    %c0_84 = arith.constant 0 : index
    %187 = vector.load %arg18[%c0_82, %c0_83, %c0_84] : memref<2x1x32xf32, #tpu.memory_space<vmem>>, vector<1x1x32xf32>
    %188 = vector.shape_cast %187 : vector<1x1x32xf32> to vector<1x32xf32>
    %cst_85 = arith.constant dense<0.000000e+00> : vector<16xf32>
    %189 = vector.multi_reduction <add>, %184, %cst_85 [1] : vector<16x32xf32> to vector<16xf32>
    %190 = vector.shape_cast %189 : vector<16xf32> to vector<16x1xf32>
    %cst_86 = arith.constant 3.200000e+01 : f32
    %191 = vector.broadcast %cst_86 : f32 to vector<16x1xf32>
    %192 = arith.divf %190, %191 : vector<16x1xf32>
    %193 = vector.broadcast %192 : vector<16x1xf32> to vector<16x32xf32>
    %194 = arith.subf %184, %193 : vector<16x32xf32>
    %195 = arith.mulf %194, %194 : vector<16x32xf32>
    %cst_87 = arith.constant dense<0.000000e+00> : vector<16xf32>
    %196 = vector.multi_reduction <add>, %195, %cst_87 [1] : vector<16x32xf32> to vector<16xf32>
    %197 = vector.shape_cast %196 : vector<16xf32> to vector<16x1xf32>
    %cst_88 = arith.constant 3.200000e+01 : f32
    %198 = vector.broadcast %cst_88 : f32 to vector<16x1xf32>
    %199 = arith.divf %197, %198 : vector<16x1xf32>
    %200 = vector.broadcast %192 : vector<16x1xf32> to vector<16x32xf32>
    %201 = arith.subf %184, %200 : vector<16x32xf32>
    %cst_89 = arith.constant 9.99999996E-13 : f32
    %202 = vector.broadcast %cst_89 : f32 to vector<16x1xf32>
    %203 = arith.addf %199, %202 : vector<16x1xf32>
    %204 = math.rsqrt %203 : vector<16x1xf32>
    %205 = vector.broadcast %204 : vector<16x1xf32> to vector<16x32xf32>
    %206 = arith.mulf %201, %205 : vector<16x32xf32>
    %207 = vector.broadcast %186 : vector<1x32xf32> to vector<16x32xf32>
    %208 = arith.mulf %206, %207 : vector<16x32xf32>
    %209 = vector.broadcast %188 : vector<1x32xf32> to vector<16x32xf32>
    %210 = arith.addf %208, %209 : vector<16x32xf32>
    %c1 = arith.constant 1 : index
    %c0_90 = arith.constant 0 : index
    %c0_91 = arith.constant 0 : index
    %211 = vector.load %arg7[%c1, %c0_90, %c0_91] : memref<2x32x96xf32, #tpu.memory_space<vmem>>, vector<1x32x96xf32>
    %212 = vector.shape_cast %211 : vector<1x32x96xf32> to vector<32x96xf32>
    %cst_92 = arith.constant dense<0.000000e+00> : vector<16x96xf32>
    %213 = tpu.matmul %210, %212, %cst_92 {dimension_numbers = #tpu.dot_dimension_numbers<[1], [0], [0], [1], [0, 0, 1, 1], [], []>} : vector<16x32xf32>, vector<32x96xf32>, vector<16x96xf32> -> vector<16x96xf32>
    %c1_93 = arith.constant 1 : index
    %c0_94 = arith.constant 0 : index
    %c0_95 = arith.constant 0 : index
    %214 = vector.load %arg8[%c1_93, %c0_94, %c0_95] : memref<2x1x96xf32, #tpu.memory_space<vmem>>, vector<1x1x96xf32>
    %215 = vector.shape_cast %214 : vector<1x1x96xf32> to vector<1x96xf32>
    %216 = vector.broadcast %215 : vector<1x96xf32> to vector<16x96xf32>
    %217 = arith.addf %213, %216 : vector<16x96xf32>
    %218 = vector.extract_strided_slice %217 {offsets = [0, 0], sizes = [8, 16], strides = [1, 1]} : vector<16x96xf32> to vector<8x16xf32>
    %219 = vector.extract_strided_slice %217 {offsets = [0, 16], sizes = [8, 16], strides = [1, 1]} : vector<16x96xf32> to vector<8x16xf32>
    %220 = vector.shape_cast %218 : vector<8x16xf32> to vector<1x8x16xf32>
    %221 = vector.shape_cast %219 : vector<8x16xf32> to vector<1x8x16xf32>
    %222 = tpu.concatenate %220, %221 in 0 : vector<1x8x16xf32>, vector<1x8x16xf32> -> vector<2x8x16xf32>
    %223 = vector.extract_strided_slice %217 {offsets = [0, 32], sizes = [8, 16], strides = [1, 1]} : vector<16x96xf32> to vector<8x16xf32>
    %224 = vector.extract_strided_slice %217 {offsets = [0, 48], sizes = [8, 16], strides = [1, 1]} : vector<16x96xf32> to vector<8x16xf32>
    %225 = vector.shape_cast %223 : vector<8x16xf32> to vector<1x8x16xf32>
    %226 = vector.shape_cast %224 : vector<8x16xf32> to vector<1x8x16xf32>
    %227 = tpu.concatenate %225, %226 in 0 : vector<1x8x16xf32>, vector<1x8x16xf32> -> vector<2x8x16xf32>
    %228 = vector.extract_strided_slice %217 {offsets = [0, 64], sizes = [8, 16], strides = [1, 1]} : vector<16x96xf32> to vector<8x16xf32>
    %229 = vector.extract_strided_slice %217 {offsets = [0, 80], sizes = [8, 16], strides = [1, 1]} : vector<16x96xf32> to vector<8x16xf32>
    %230 = vector.shape_cast %228 : vector<8x16xf32> to vector<1x8x16xf32>
    %231 = vector.shape_cast %229 : vector<8x16xf32> to vector<1x8x16xf32>
    %232 = tpu.concatenate %230, %231 in 0 : vector<1x8x16xf32>, vector<1x8x16xf32> -> vector<2x8x16xf32>
    "tpu.trace_start"() <{level = 10 : i32, message = "hqd,hkd->hqk"}> : () -> ()
    %cst_96 = arith.constant dense<0.000000e+00> : vector<2x8x8xf32>
    %233 = tpu.matmul %222, %227, %cst_96 {dimension_numbers = #tpu.dot_dimension_numbers<[2], [2], [1], [1], [0, 0, 0, 1, 1, 1], [0], [0]>} : vector<2x8x16xf32>, vector<2x8x16xf32>, vector<2x8x8xf32> -> vector<2x8x8xf32>
    "tpu.trace_stop"() : () -> ()
    %234 = vector.extract_strided_slice %38 {offsets = [0, 0, 0], sizes = [1, 1, 8], strides = [1, 1, 1]} : vector<2x1x8xf32> to vector<1x1x8xf32>
    %235 = vector.shape_cast %234 : vector<1x1x8xf32> to vector<1x8xf32>
    %236 = vector.shape_cast %235 : vector<1x8xf32> to vector<1x1x8xf32>
    %237 = vector.broadcast %236 : vector<1x1x8xf32> to vector<2x8x8xf32>
    %238 = arith.addf %233, %237 : vector<2x8x8xf32>
    %cst_97 = arith.constant dense<0xFF800000> : vector<2x8xf32>
    %239 = vector.multi_reduction <maximumf>, %238, %cst_97 [2] : vector<2x8x8xf32> to vector<2x8xf32>
    %240 = vector.shape_cast %239 : vector<2x8xf32> to vector<2x8x1xf32>
    %241 = vector.broadcast %240 : vector<2x8x1xf32> to vector<2x8x8xf32>
    %242 = arith.subf %238, %241 : vector<2x8x8xf32>
    %243 = math.exp %242 : vector<2x8x8xf32>
    %cst_98 = arith.constant dense<0.000000e+00> : vector<2x8xf32>
    %244 = vector.multi_reduction <add>, %243, %cst_98 [2] : vector<2x8x8xf32> to vector<2x8xf32>
    %245 = vector.shape_cast %244 : vector<2x8xf32> to vector<2x8x1xf32>
    %246 = tpu.reciprocal %245 {approx = true} : vector<2x8x1xf32> -> vector<2x8x1xf32>
    %247 = vector.broadcast %246 : vector<2x8x1xf32> to vector<2x8x8xf32>
    %248 = arith.mulf %243, %247 : vector<2x8x8xf32>
    "tpu.trace_start"() <{level = 10 : i32, message = "hqk,hkd->hqd"}> : () -> ()
    %cst_99 = arith.constant dense<0.000000e+00> : vector<2x8x16xf32>
    %249 = tpu.matmul %248, %232, %cst_99 {dimension_numbers = #tpu.dot_dimension_numbers<[2], [1], [1], [2], [0, 0, 0, 1, 1, 2], [0], [0]>} : vector<2x8x8xf32>, vector<2x8x16xf32>, vector<2x8x16xf32> -> vector<2x8x16xf32>
    "tpu.trace_stop"() : () -> ()
    %250 = vector.extract_strided_slice %249 {offsets = [0, 0, 0], sizes = [1, 8, 16], strides = [1, 1, 1]} : vector<2x8x16xf32> to vector<1x8x16xf32>
    %251 = vector.shape_cast %250 : vector<1x8x16xf32> to vector<8x16xf32>
    %c0_100 = arith.constant 0 : index
    %c0_101 = arith.constant 0 : index
    %252 = vector.load %arg20[%c0_100, %c0_101] : memref<16x32xf32, #tpu.memory_space<vmem>>, vector<8x16xf32>
    tpu.vector_store %arg20[%c0_100, %c0_101], %251 {strides = array<i32>} : memref<16x32xf32, #tpu.memory_space<vmem>>, vector<8x16xf32>,
    %253 = vector.extract_strided_slice %249 {offsets = [1, 0, 0], sizes = [1, 8, 16], strides = [1, 1, 1]} : vector<2x8x16xf32> to vector<1x8x16xf32>
    %254 = vector.shape_cast %253 : vector<1x8x16xf32> to vector<8x16xf32>
    %c0_102 = arith.constant 0 : index
    %c16_103 = arith.constant 16 : index
    %255 = vector.load %arg20[%c0_102, %c16_103] : memref<16x32xf32, #tpu.memory_space<vmem>>, vector<8x16xf32>
    tpu.vector_store %arg20[%c0_102, %c16_103], %254 {strides = array<i32>} : memref<16x32xf32, #tpu.memory_space<vmem>>, vector<8x16xf32>,
    %256 = vector.extract_strided_slice %217 {offsets = [8, 0], sizes = [8, 16], strides = [1, 1]} : vector<16x96xf32> to vector<8x16xf32>
    %257 = vector.extract_strided_slice %217 {offsets = [8, 16], sizes = [8, 16], strides = [1, 1]} : vector<16x96xf32> to vector<8x16xf32>
    %258 = vector.shape_cast %256 : vector<8x16xf32> to vector<1x8x16xf32>
    %259 = vector.shape_cast %257 : vector<8x16xf32> to vector<1x8x16xf32>
    %260 = tpu.concatenate %258, %259 in 0 : vector<1x8x16xf32>, vector<1x8x16xf32> -> vector<2x8x16xf32>
    %261 = vector.extract_strided_slice %217 {offsets = [8, 32], sizes = [8, 16], strides = [1, 1]} : vector<16x96xf32> to vector<8x16xf32>
    %262 = vector.extract_strided_slice %217 {offsets = [8, 48], sizes = [8, 16], strides = [1, 1]} : vector<16x96xf32> to vector<8x16xf32>
    %263 = vector.shape_cast %261 : vector<8x16xf32> to vector<1x8x16xf32>
    %264 = vector.shape_cast %262 : vector<8x16xf32> to vector<1x8x16xf32>
    %265 = tpu.concatenate %263, %264 in 0 : vector<1x8x16xf32>, vector<1x8x16xf32> -> vector<2x8x16xf32>
    %266 = vector.extract_strided_slice %217 {offsets = [8, 64], sizes = [8, 16], strides = [1, 1]} : vector<16x96xf32> to vector<8x16xf32>
    %267 = vector.extract_strided_slice %217 {offsets = [8, 80], sizes = [8, 16], strides = [1, 1]} : vector<16x96xf32> to vector<8x16xf32>
    %268 = vector.shape_cast %266 : vector<8x16xf32> to vector<1x8x16xf32>
    %269 = vector.shape_cast %267 : vector<8x16xf32> to vector<1x8x16xf32>
    %270 = tpu.concatenate %268, %269 in 0 : vector<1x8x16xf32>, vector<1x8x16xf32> -> vector<2x8x16xf32>
    "tpu.trace_start"() <{level = 10 : i32, message = "hqd,hkd->hqk"}> : () -> ()
    %cst_104 = arith.constant dense<0.000000e+00> : vector<2x8x8xf32>
    %271 = tpu.matmul %260, %265, %cst_104 {dimension_numbers = #tpu.dot_dimension_numbers<[2], [2], [1], [1], [0, 0, 0, 1, 1, 1], [0], [0]>} : vector<2x8x16xf32>, vector<2x8x16xf32>, vector<2x8x8xf32> -> vector<2x8x8xf32>
    "tpu.trace_stop"() : () -> ()
    %272 = vector.extract_strided_slice %38 {offsets = [1, 0, 0], sizes = [1, 1, 8], strides = [1, 1, 1]} : vector<2x1x8xf32> to vector<1x1x8xf32>
    %273 = vector.shape_cast %272 : vector<1x1x8xf32> to vector<1x8xf32>
    %274 = vector.shape_cast %273 : vector<1x8xf32> to vector<1x1x8xf32>
    %275 = vector.broadcast %274 : vector<1x1x8xf32> to vector<2x8x8xf32>
    %276 = arith.addf %271, %275 : vector<2x8x8xf32>
    %cst_105 = arith.constant dense<0xFF800000> : vector<2x8xf32>
    %277 = vector.multi_reduction <maximumf>, %276, %cst_105 [2] : vector<2x8x8xf32> to vector<2x8xf32>
    %278 = vector.shape_cast %277 : vector<2x8xf32> to vector<2x8x1xf32>
    %279 = vector.broadcast %278 : vector<2x8x1xf32> to vector<2x8x8xf32>
    %280 = arith.subf %276, %279 : vector<2x8x8xf32>
    %281 = math.exp %280 : vector<2x8x8xf32>
    %cst_106 = arith.constant dense<0.000000e+00> : vector<2x8xf32>
    %282 = vector.multi_reduction <add>, %281, %cst_106 [2] : vector<2x8x8xf32> to vector<2x8xf32>
    %283 = vector.shape_cast %282 : vector<2x8xf32> to vector<2x8x1xf32>
    %284 = tpu.reciprocal %283 {approx = true} : vector<2x8x1xf32> -> vector<2x8x1xf32>
    %285 = vector.broadcast %284 : vector<2x8x1xf32> to vector<2x8x8xf32>
    %286 = arith.mulf %281, %285 : vector<2x8x8xf32>
    "tpu.trace_start"() <{level = 10 : i32, message = "hqk,hkd->hqd"}> : () -> ()
    %cst_107 = arith.constant dense<0.000000e+00> : vector<2x8x16xf32>
    %287 = tpu.matmul %286, %270, %cst_107 {dimension_numbers = #tpu.dot_dimension_numbers<[2], [1], [1], [2], [0, 0, 0, 1, 1, 2], [0], [0]>} : vector<2x8x8xf32>, vector<2x8x16xf32>, vector<2x8x16xf32> -> vector<2x8x16xf32>
    "tpu.trace_stop"() : () -> ()
    %288 = vector.extract_strided_slice %287 {offsets = [0, 0, 0], sizes = [1, 8, 16], strides = [1, 1, 1]} : vector<2x8x16xf32> to vector<1x8x16xf32>
    %289 = vector.shape_cast %288 : vector<1x8x16xf32> to vector<8x16xf32>
    %c8_108 = arith.constant 8 : index
    %c0_109 = arith.constant 0 : index
    %290 = vector.load %arg20[%c8_108, %c0_109] : memref<16x32xf32, #tpu.memory_space<vmem>>, vector<8x16xf32>
    tpu.vector_store %arg20[%c8_108, %c0_109], %289 {strides = array<i32>} : memref<16x32xf32, #tpu.memory_space<vmem>>, vector<8x16xf32>,
    %291 = vector.extract_strided_slice %287 {offsets = [1, 0, 0], sizes = [1, 8, 16], strides = [1, 1, 1]} : vector<2x8x16xf32> to vector<1x8x16xf32>
    %292 = vector.shape_cast %291 : vector<1x8x16xf32> to vector<8x16xf32>
    %c8_110 = arith.constant 8 : index
    %c16_111 = arith.constant 16 : index
    %293 = vector.load %arg20[%c8_110, %c16_111] : memref<16x32xf32, #tpu.memory_space<vmem>>, vector<8x16xf32>
    tpu.vector_store %arg20[%c8_110, %c16_111], %292 {strides = array<i32>} : memref<16x32xf32, #tpu.memory_space<vmem>>, vector<8x16xf32>,
    %c0_112 = arith.constant 0 : index
    %c0_113 = arith.constant 0 : index
    %294 = vector.load %arg20[%c0_112, %c0_113] : memref<16x32xf32, #tpu.memory_space<vmem>>, vector<16x32xf32>
    %c1_114 = arith.constant 1 : index
    %c0_115 = arith.constant 0 : index
    %c0_116 = arith.constant 0 : index
    %295 = vector.load %arg9[%c1_114, %c0_115, %c0_116] : memref<2x32x32xf32, #tpu.memory_space<vmem>>, vector<1x32x32xf32>
    %296 = vector.shape_cast %295 : vector<1x32x32xf32> to vector<32x32xf32>
    %cst_117 = arith.constant dense<0.000000e+00> : vector<16x32xf32>
    %297 = tpu.matmul %294, %296, %cst_117 {dimension_numbers = #tpu.dot_dimension_numbers<[1], [0], [0], [1], [0, 0, 1, 1], [], []>} : vector<16x32xf32>, vector<32x32xf32>, vector<16x32xf32> -> vector<16x32xf32>
    %c1_118 = arith.constant 1 : index
    %c0_119 = arith.constant 0 : index
    %c0_120 = arith.constant 0 : index
    %298 = vector.load %arg10[%c1_118, %c0_119, %c0_120] : memref<2x1x32xf32, #tpu.memory_space<vmem>>, vector<1x1x32xf32>
    %299 = vector.shape_cast %298 : vector<1x1x32xf32> to vector<1x32xf32>
    %300 = vector.broadcast %299 : vector<1x32xf32> to vector<16x32xf32>
    %301 = arith.addf %297, %300 : vector<16x32xf32>
    %302 = arith.addf %210, %301 : vector<16x32xf32>
    %c1_121 = arith.constant 1 : index
    %c0_122 = arith.constant 0 : index
    %c0_123 = arith.constant 0 : index
    %303 = vector.load %arg11[%c1_121, %c0_122, %c0_123] : memref<2x1x32xf32, #tpu.memory_space<vmem>>, vector<1x1x32xf32>
    %304 = vector.shape_cast %303 : vector<1x1x32xf32> to vector<1x32xf32>
    %c1_124 = arith.constant 1 : index
    %c0_125 = arith.constant 0 : index
    %c0_126 = arith.constant 0 : index
    %305 = vector.load %arg12[%c1_124, %c0_125, %c0_126] : memref<2x1x32xf32, #tpu.memory_space<vmem>>, vector<1x1x32xf32>
    %306 = vector.shape_cast %305 : vector<1x1x32xf32> to vector<1x32xf32>
    %cst_127 = arith.constant dense<0.000000e+00> : vector<16xf32>
    %307 = vector.multi_reduction <add>, %302, %cst_127 [1] : vector<16x32xf32> to vector<16xf32>
    %308 = vector.shape_cast %307 : vector<16xf32> to vector<16x1xf32>
    %cst_128 = arith.constant 3.200000e+01 : f32
    %309 = vector.broadcast %cst_128 : f32 to vector<16x1xf32>
    %310 = arith.divf %308, %309 : vector<16x1xf32>
    %311 = vector.broadcast %310 : vector<16x1xf32> to vector<16x32xf32>
    %312 = arith.subf %302, %311 : vector<16x32xf32>
    %313 = arith.mulf %312, %312 : vector<16x32xf32>
    %cst_129 = arith.constant dense<0.000000e+00> : vector<16xf32>
    %314 = vector.multi_reduction <add>, %313, %cst_129 [1] : vector<16x32xf32> to vector<16xf32>
    %315 = vector.shape_cast %314 : vector<16xf32> to vector<16x1xf32>
    %cst_130 = arith.constant 3.200000e+01 : f32
    %316 = vector.broadcast %cst_130 : f32 to vector<16x1xf32>
    %317 = arith.divf %315, %316 : vector<16x1xf32>
    %318 = vector.broadcast %310 : vector<16x1xf32> to vector<16x32xf32>
    %319 = arith.subf %302, %318 : vector<16x32xf32>
    %cst_131 = arith.constant 9.99999996E-13 : f32
    %320 = vector.broadcast %cst_131 : f32 to vector<16x1xf32>
    %321 = arith.addf %317, %320 : vector<16x1xf32>
    %322 = math.rsqrt %321 : vector<16x1xf32>
    %323 = vector.broadcast %322 : vector<16x1xf32> to vector<16x32xf32>
    %324 = arith.mulf %319, %323 : vector<16x32xf32>
    %325 = vector.broadcast %304 : vector<1x32xf32> to vector<16x32xf32>
    %326 = arith.mulf %324, %325 : vector<16x32xf32>
    %327 = vector.broadcast %306 : vector<1x32xf32> to vector<16x32xf32>
    %328 = arith.addf %326, %327 : vector<16x32xf32>
    %c1_132 = arith.constant 1 : index
    %c0_133 = arith.constant 0 : index
    %c0_134 = arith.constant 0 : index
    %329 = vector.load %arg13[%c1_132, %c0_133, %c0_134] : memref<2x32x64xf32, #tpu.memory_space<vmem>>, vector<1x32x64xf32>
    %330 = vector.shape_cast %329 : vector<1x32x64xf32> to vector<32x64xf32>
    %cst_135 = arith.constant dense<0.000000e+00> : vector<16x64xf32>
    %331 = tpu.matmul %328, %330, %cst_135 {dimension_numbers = #tpu.dot_dimension_numbers<[1], [0], [0], [1], [0, 0, 1, 1], [], []>} : vector<16x32xf32>, vector<32x64xf32>, vector<16x64xf32> -> vector<16x64xf32>
    %c1_136 = arith.constant 1 : index
    %c0_137 = arith.constant 0 : index
    %c0_138 = arith.constant 0 : index
    %332 = vector.load %arg14[%c1_136, %c0_137, %c0_138] : memref<2x1x64xf32, #tpu.memory_space<vmem>>, vector<1x1x64xf32>
    %333 = vector.shape_cast %332 : vector<1x1x64xf32> to vector<1x64xf32>
    %334 = vector.broadcast %333 : vector<1x64xf32> to vector<16x64xf32>
    %335 = arith.addf %331, %334 : vector<16x64xf32>
    %336 = arith.mulf %335, %335 : vector<16x64xf32>
    %337 = arith.mulf %335, %336 : vector<16x64xf32>
    %cst_139 = arith.constant 4.471500e-02 : f32
    %338 = vector.broadcast %cst_139 : f32 to vector<16x64xf32>
    %339 = arith.mulf %338, %337 : vector<16x64xf32>
    %340 = arith.addf %335, %339 : vector<16x64xf32>
    %cst_140 = arith.constant 0.797884583 : f32
    %341 = vector.broadcast %cst_140 : f32 to vector<16x64xf32>
    %342 = arith.mulf %341, %340 : vector<16x64xf32>
    %343 = math.tanh %342 : vector<16x64xf32>
    %cst_141 = arith.constant 1.000000e+00 : f32
    %344 = vector.broadcast %cst_141 : f32 to vector<16x64xf32>
    %345 = arith.addf %344, %343 : vector<16x64xf32>
    %cst_142 = arith.constant 5.000000e-01 : f32
    %346 = vector.broadcast %cst_142 : f32 to vector<16x64xf32>
    %347 = arith.mulf %346, %345 : vector<16x64xf32>
    %348 = arith.mulf %335, %347 : vector<16x64xf32>
    %c1_143 = arith.constant 1 : index
    %c0_144 = arith.constant 0 : index
    %c0_145 = arith.constant 0 : index
    %349 = vector.load %arg15[%c1_143, %c0_144, %c0_145] : memref<2x64x32xf32, #tpu.memory_space<vmem>>, vector<1x64x32xf32>
    %350 = vector.shape_cast %349 : vector<1x64x32xf32> to vector<64x32xf32>
    %cst_146 = arith.constant dense<0.000000e+00> : vector<16x32xf32>
    %351 = tpu.matmul %348, %350, %cst_146 {dimension_numbers = #tpu.dot_dimension_numbers<[1], [0], [0], [1], [0, 0, 1, 1], [], []>} : vector<16x64xf32>, vector<64x32xf32>, vector<16x32xf32> -> vector<16x32xf32>
    %c1_147 = arith.constant 1 : index
    %c0_148 = arith.constant 0 : index
    %c0_149 = arith.constant 0 : index
    %352 = vector.load %arg16[%c1_147, %c0_148, %c0_149] : memref<2x1x32xf32, #tpu.memory_space<vmem>>, vector<1x1x32xf32>
    %353 = vector.shape_cast %352 : vector<1x1x32xf32> to vector<1x32xf32>
    %354 = vector.broadcast %353 : vector<1x32xf32> to vector<16x32xf32>
    %355 = arith.addf %351, %354 : vector<16x32xf32>
    %356 = arith.addf %328, %355 : vector<16x32xf32>
    %c1_150 = arith.constant 1 : index
    %c0_151 = arith.constant 0 : index
    %c0_152 = arith.constant 0 : index
    %357 = vector.load %arg17[%c1_150, %c0_151, %c0_152] : memref<2x1x32xf32, #tpu.memory_space<vmem>>, vector<1x1x32xf32>
    %358 = vector.shape_cast %357 : vector<1x1x32xf32> to vector<1x32xf32>
    %c1_153 = arith.constant 1 : index
    %c0_154 = arith.constant 0 : index
    %c0_155 = arith.constant 0 : index
    %359 = vector.load %arg18[%c1_153, %c0_154, %c0_155] : memref<2x1x32xf32, #tpu.memory_space<vmem>>, vector<1x1x32xf32>
    %360 = vector.shape_cast %359 : vector<1x1x32xf32> to vector<1x32xf32>
    %cst_156 = arith.constant dense<0.000000e+00> : vector<16xf32>
    %361 = vector.multi_reduction <add>, %356, %cst_156 [1] : vector<16x32xf32> to vector<16xf32>
    %362 = vector.shape_cast %361 : vector<16xf32> to vector<16x1xf32>
    %cst_157 = arith.constant 3.200000e+01 : f32
    %363 = vector.broadcast %cst_157 : f32 to vector<16x1xf32>
    %364 = arith.divf %362, %363 : vector<16x1xf32>
    %365 = vector.broadcast %364 : vector<16x1xf32> to vector<16x32xf32>
    %366 = arith.subf %356, %365 : vector<16x32xf32>
    %367 = arith.mulf %366, %366 : vector<16x32xf32>
    %cst_158 = arith.constant dense<0.000000e+00> : vector<16xf32>
    %368 = vector.multi_reduction <add>, %367, %cst_158 [1] : vector<16x32xf32> to vector<16xf32>
    %369 = vector.shape_cast %368 : vector<16xf32> to vector<16x1xf32>
    %cst_159 = arith.constant 3.200000e+01 : f32
    %370 = vector.broadcast %cst_159 : f32 to vector<16x1xf32>
    %371 = arith.divf %369, %370 : vector<16x1xf32>
    %372 = vector.broadcast %364 : vector<16x1xf32> to vector<16x32xf32>
    %373 = arith.subf %356, %372 : vector<16x32xf32>
    %cst_160 = arith.constant 9.99999996E-13 : f32
    %374 = vector.broadcast %cst_160 : f32 to vector<16x1xf32>
    %375 = arith.addf %371, %374 : vector<16x1xf32>
    %376 = math.rsqrt %375 : vector<16x1xf32>
    %377 = vector.broadcast %376 : vector<16x1xf32> to vector<16x32xf32>
    %378 = arith.mulf %373, %377 : vector<16x32xf32>
    %379 = vector.broadcast %358 : vector<1x32xf32> to vector<16x32xf32>
    %380 = arith.mulf %378, %379 : vector<16x32xf32>
    %381 = vector.broadcast %360 : vector<1x32xf32> to vector<16x32xf32>
    %382 = arith.addf %380, %381 : vector<16x32xf32>
    %383 = vector.shape_cast %382 : vector<16x32xf32> to vector<2x8x32xf32>
    %c0_161 = arith.constant 0 : index
    %c0_162 = arith.constant 0 : index
    %c0_163 = arith.constant 0 : index
    %384 = vector.load %arg19[%c0_161, %c0_162, %c0_163] : memref<2x8x32xf32, #tpu.memory_space<vmem>>, vector<2x8x32xf32>
    tpu.vector_store %arg19[%c0_161, %c0_162, %c0_163], %383 {strides = array<i32>} : memref<2x8x32xf32, #tpu.memory_space<vmem>>, vector<2x8x32xf32>,
    return
  }
  func.func @transform_0(%arg0: i32) -> (i32, i32, i32) {
    %c0_i32 = arith.constant 0 : i32
    %c0_i32_0 = arith.constant 0 : i32
    %c0_i32_1 = arith.constant 0 : i32
    return %arg0, %c0_i32, %c0_i32_0 : i32, i32, i32
  }
  func.func @transform_1(%arg0: i32) -> (i32, i32, i32) {
    %c0_i32 = arith.constant 0 : i32
    %c0_i32_0 = arith.constant 0 : i32
    %c0_i32_1 = arith.constant 0 : i32
    return %arg0, %c0_i32, %c0_i32_0 : i32, i32, i32
  }
  func.func @transform_2(%arg0: i32) -> (i32, i32, i32) {
    %c0_i32 = arith.constant 0 : i32
    %c0_i32_0 = arith.constant 0 : i32
    %c0_i32_1 = arith.constant 0 : i32
    return %arg0, %c0_i32, %c0_i32_0 : i32, i32, i32
  }
  func.func @transform_3(%arg0: i32) -> (i32, i32) {
    %c0_i32 = arith.constant 0 : i32
    %c0_i32_0 = arith.constant 0 : i32
    %c0_i32_1 = arith.constant 0 : i32
    return %c0_i32, %c0_i32_0 : i32, i32
  }
  func.func @transform_4(%arg0: i32) -> (i32, i32) {
    %c0_i32 = arith.constant 0 : i32
    %c0_i32_0 = arith.constant 0 : i32
    %c0_i32_1 = arith.constant 0 : i32
    return %c0_i32, %c0_i32_0 : i32, i32
  }
  func.func @transform_5(%arg0: i32) -> (i32, i32) {
    %c0_i32 = arith.constant 0 : i32
    %c0_i32_0 = arith.constant 0 : i32
    %c0_i32_1 = arith.constant 0 : i32
    return %c0_i32, %c0_i32_0 : i32, i32
  }
  func.func @transform_6(%arg0: i32) -> (i32, i32, i32) {
    %c0_i32 = arith.constant 0 : i32
    %c0_i32_0 = arith.constant 0 : i32
    %c0_i32_1 = arith.constant 0 : i32
    %c0_i32_2 = arith.constant 0 : i32
    return %c0_i32, %c0_i32_0, %c0_i32_1 : i32, i32, i32
  }
  func.func @transform_7(%arg0: i32) -> (i32, i32, i32) {
    %c0_i32 = arith.constant 0 : i32
    %c0_i32_0 = arith.constant 0 : i32
    %c0_i32_1 = arith.constant 0 : i32
    %c0_i32_2 = arith.constant 0 : i32
    return %c0_i32, %c0_i32_0, %c0_i32_1 : i32, i32, i32
  }
  func.func @transform_8(%arg0: i32) -> (i32, i32, i32) {
    %c0_i32 = arith.constant 0 : i32
    %c0_i32_0 = arith.constant 0 : i32
    %c0_i32_1 = arith.constant 0 : i32
    %c0_i32_2 = arith.constant 0 : i32
    return %c0_i32, %c0_i32_0, %c0_i32_1 : i32, i32, i32
  }
  func.func @transform_9(%arg0: i32) -> (i32, i32, i32) {
    %c0_i32 = arith.constant 0 : i32
    %c0_i32_0 = arith.constant 0 : i32
    %c0_i32_1 = arith.constant 0 : i32
    %c0_i32_2 = arith.constant 0 : i32
    return %c0_i32, %c0_i32_0, %c0_i32_1 : i32, i32, i32
  }
  func.func @transform_10(%arg0: i32) -> (i32, i32, i32) {
    %c0_i32 = arith.constant 0 : i32
    %c0_i32_0 = arith.constant 0 : i32
    %c0_i32_1 = arith.constant 0 : i32
    %c0_i32_2 = arith.constant 0 : i32
    return %c0_i32, %c0_i32_0, %c0_i32_1 : i32, i32, i32
  }
  func.func @transform_11(%arg0: i32) -> (i32, i32, i32) {
    %c0_i32 = arith.constant 0 : i32
    %c0_i32_0 = arith.constant 0 : i32
    %c0_i32_1 = arith.constant 0 : i32
    %c0_i32_2 = arith.constant 0 : i32
    return %c0_i32, %c0_i32_0, %c0_i32_1 : i32, i32, i32
  }
  func.func @transform_12(%arg0: i32) -> (i32, i32, i32) {
    %c0_i32 = arith.constant 0 : i32
    %c0_i32_0 = arith.constant 0 : i32
    %c0_i32_1 = arith.constant 0 : i32
    %c0_i32_2 = arith.constant 0 : i32
    return %c0_i32, %c0_i32_0, %c0_i32_1 : i32, i32, i32
  }
  func.func @transform_13(%arg0: i32) -> (i32, i32, i32) {
    %c0_i32 = arith.constant 0 : i32
    %c0_i32_0 = arith.constant 0 : i32
    %c0_i32_1 = arith.constant 0 : i32
    %c0_i32_2 = arith.constant 0 : i32
    return %c0_i32, %c0_i32_0, %c0_i32_1 : i32, i32, i32
  }
  func.func @transform_14(%arg0: i32) -> (i32, i32, i32) {
    %c0_i32 = arith.constant 0 : i32
    %c0_i32_0 = arith.constant 0 : i32
    %c0_i32_1 = arith.constant 0 : i32
    %c0_i32_2 = arith.constant 0 : i32
    return %c0_i32, %c0_i32_0, %c0_i32_1 : i32, i32, i32
  }
  func.func @transform_15(%arg0: i32) -> (i32, i32, i32) {
    %c0_i32 = arith.constant 0 : i32
    %c0_i32_0 = arith.constant 0 : i32
    %c0_i32_1 = arith.constant 0 : i32
    %c0_i32_2 = arith.constant 0 : i32
    return %c0_i32, %c0_i32_0, %c0_i32_1 : i32, i32, i32
  }
  func.func @transform_16(%arg0: i32) -> (i32, i32, i32) {
    %c0_i32 = arith.constant 0 : i32
    %c0_i32_0 = arith.constant 0 : i32
    %c0_i32_1 = arith.constant 0 : i32
    %c0_i32_2 = arith.constant 0 : i32
    return %c0_i32, %c0_i32_0, %c0_i32_1 : i32, i32, i32
  }
  func.func @transform_17(%arg0: i32) -> (i32, i32, i32) {
    %c0_i32 = arith.constant 0 : i32
    %c0_i32_0 = arith.constant 0 : i32
    %c0_i32_1 = arith.constant 0 : i32
    %c0_i32_2 = arith.constant 0 : i32
    return %c0_i32, %c0_i32_0, %c0_i32_1 : i32, i32, i32
  }
  func.func @transform_18(%arg0: i32) -> (i32, i32, i32) {
    %c0_i32 = arith.constant 0 : i32
    %c0_i32_0 = arith.constant 0 : i32
    %c0_i32_1 = arith.constant 0 : i32
    return %arg0, %c0_i32, %c0_i32_0 : i32, i32, i32
  }
}

</mosaic_0001>

<bundles_post_ra>
// kernel: tpu_custom_call.1
= control target key start
LH: loop header
LB: loop body
LE: loop exit
PB: predicated region body
PF: predicated region fallthrough
CT: control target
= control target key end

     0   :  { %s2260_s0 = inlined_call_operand.hbm [shape: f32[2,8,32], index: 0, kind: input, shape index: {}]   ;;  %s2261_s1 = inlined_call_operand.hbm [shape: f32[2,8,32], index: 1, kind: input, shape index: {}]   ;;  %s2262_s2 = inlined_call_operand.hbm [shape: f32[2,1,8], index: 2, kind: input, shape index: {}]   ;;  %s2263_s3 = inlined_call_operand.hbm [shape: f32[8,32], index: 3, kind: input, shape index: {}]   ;;  %s2264_s4 = inlined_call_operand.hbm [shape: f32[1,32], index: 4, kind: input, shape index: {}]   ;;  %s2265_s5 = inlined_call_operand.hbm [shape: f32[1,32], index: 5, kind: input, shape index: {}]   ;;  %s2266_s6 = inlined_call_operand.vmem [shape: f32[2,32,96], index: 6, kind: input, shape index: {}]   ;;  %s2267_s7 = inlined_call_operand.vmem [shape: f32[2,1,96], index: 7, kind: input, shape index: {}]   ;;  %s2268_s8 = inlined_call_operand.vmem [shape: f32[2,32,32], index: 8, kind: input, shape index: {}]   ;;  %s2269_s9 = inlined_call_operand.vmem [shape: f32[2,1,32], index: 9, kind: input, shape index: {}]   ;;  %s2270_s10 = inlined_call_operand.vmem [shape: f32[2,1,32], index: 10, kind: input, shape index: {}]   ;;  %s2271_s11 = inlined_call_operand.vmem [shape: f32[2,1,32], index: 11, kind: input, shape index: {}]   ;;  %s2272_s12 = inlined_call_operand.vmem [shape: f32[2,32,64], index: 12, kind: input, shape index: {}]   ;;  %s2273_s13 = inlined_call_operand.vmem [shape: f32[2,1,64], index: 13, kind: input, shape index: {}]   ;;  %s2274_s14 = inlined_call_operand.vmem [shape: f32[2,64,32], index: 14, kind: input, shape index: {}]   ;;  %s2275_s15 = inlined_call_operand.vmem [shape: f32[2,1,32], index: 15, kind: input, shape index: {}]   ;;  %s2276_s16 = inlined_call_operand.vmem [shape: f32[2,1,32], index: 16, kind: input, shape index: {}]   ;;  %s2277_s17 = inlined_call_operand.hbm [shape: f32[2,1,32], index: 17, kind: input, shape index: {}]   ;;  %s2278_s18 = inlined_call_operand.hbm [shape: f32[2,8,32], index: 18, kind: output, shape index: {}]  }
   0x1   :  { %2283 = sst [smem:[#allocation21_spill]] %s2260_s0 }
   0x2   :  { %2284 = sst [smem:[#allocation22_spill]] %s2261_s1 }
   0x3   :  { %2285 = sst [smem:[#allocation23_spill]] %s2262_s2 }
   0x4   :  { %2286 = sst [smem:[#allocation24_spill]] %s2278_s18 }
   0x5   :  { %23 = vsyncpa [#allocation4], 0 }
   0x6   :  { %24 = vsyncpa [#allocation7], 0 }
   0x7   :  { %25 = vsyncpa [#allocation10], 0 }
   0x8   :  { %26 = vsyncpa [#allocation13], 0 }
   0x9   :  { %27 = vsyncpa [#allocation5], 0  ;;  %s2287_s29 = sld [smem:[#allocation22_spill]]  ;;  %s1774_s0 = smov [#allocation6]  }
   0xa   :  { %s47_s19 = sshll.u32 %s1774_s0, 4  ;;  %s72_s21 = sshll.u32 %s2263_s3, 4  ;;  %s48_s19 = int_to_ptr.vmem [resolvable:$true] %s47_s19  ;;  %s73_s21 = int_to_ptr.hbm [resolvable:$true] %s72_s21 }
   0xb   :  { %s2279_s22 = smov 128   ;;  %s2281_s2 = smov 8  }
   0xc   :  { %s1777_s23 = smov [#allocation9]   ;;  %s94_s27 = sshll.u32 %s2265_s5, 4  ;;  %s95_s27 = int_to_ptr.hbm [resolvable:$true] %s94_s27 }
   0xd   :  { %s74_s24 = sshll.u32 %s1777_s23, 4  ;;  %s2288_s0 = sld [smem:[#allocation21_spill]]  ;;  %s75_s24 = int_to_ptr.vmem [resolvable:$true] %s74_s24 }
   0xe   :  { %77 = dma.hbm_to_vmem [thread:$0]  %s73_s21, 128, %s75_s24, [#allocation10]  }
   0xf   :  { %s45_s30 = sshll.u32 %s2287_s29, 4  ;;  %s1778_s1 = smov [#allocation12]   ;;  %s46_s30 = int_to_ptr.hbm [resolvable:$true] %s45_s30 }
  0x10   :  { %53 = dma.hbm_to_vmem [thread:$0]  %s46_s30, 256, %s48_s19, [#allocation7], %s2279_s22, %s2279_s22, %s2281_s2  }
  0x11   :  { %s96_s20 = sshll.u32 %s1778_s1, 4  ;;  %s1779_s30 = smov [#allocation3]   ;;  %s97_s20 = int_to_ptr.vmem [resolvable:$true] %s96_s20 }
  0x12   :  { %99 = dma.hbm_to_vmem [thread:$0]  %s95_s27, 16, %s97_s20, [#allocation13]  }
  0x13   :  { %s32_s3 = sshll.u32 %s2288_s0, 4  ;;  %s34_s19 = sshll.u32 %s1779_s30, 4  ;;  %s33_s3 = int_to_ptr.hbm [resolvable:$true] %s32_s3  ;;  %s35_s19 = int_to_ptr.vmem [resolvable:$true] %s34_s19 }
  0x14   :  { %s2289_s2 = sld [smem:[#allocation23_spill]]  ;;  %s2290_s5 = smov 8  }
  0x15   :  { %s2291_s25 = smov 128   ;;  %s1780_s21 = smov [#allocation8]  }
  0x16   :  { %40 = dma.hbm_to_vmem [thread:$0]  %s33_s3, 256, %s35_s19, [#allocation4], %s2291_s25, %s2291_s25, %s2290_s5  }
  0x17   :  { %s60_s24 = sshll.u32 %s1780_s21, 4  ;;  %s83_s29 = sshll.u32 %s2264_s4, 4  ;;  %s61_s24 = int_to_ptr.vmem [resolvable:$true] %s60_s24  ;;  %s84_s29 = int_to_ptr.hbm [resolvable:$true] %s83_s29 }
  0x18   :  { %s1781_s27 = smov 16   ;;  %s1782_s0 = smov 1  }
  0x19   :  { %s1783_s22 = smov [#allocation11]   ;;  %s126_s30 = sshll.u32 %s2277_s17, 4  ;;  %s127_s30 = int_to_ptr.hbm [resolvable:$true] %s126_s30 }
  0x1a   :  { %s58_s18 = sshll.u32 %s2289_s2, 4  ;;  %s85_s2 = sshll.u32 %s1783_s22, 4  ;;  %s59_s18 = int_to_ptr.hbm [resolvable:$true] %s58_s18  ;;  %s86_s2 = int_to_ptr.vmem [resolvable:$true] %s85_s2 }
  0x1b   :  { %66 = dma.hbm_to_vmem [thread:$0]  %s59_s18, 32, %s61_s24, [#allocation7], %s1781_s27, %s1781_s27, %s1782_s0  }
  0x1c   :  { %88 = dma.hbm_to_vmem [thread:$0]  %s84_s29, 16, %s86_s2, [#allocation10]  }
  0x1d   :  { %s1784_s3 = smov [#allocation14]  }
  0x1e   :  { %s128_s19 = sshll.u32 %s1784_s3, 4  ;;  %s129_s19 = int_to_ptr.vmem [resolvable:$true] %s128_s19 }
  0x1f   :  { %134 = dma.hbm_to_vmem [thread:$0]  %s127_s30, 32, %s129_s19, [#allocation13], %s1781_s27, %s1781_s27, %s1782_s0  }
  0x20   :  { %1764 = dma.done.wait [#allocation4], 256  }
  0x21   :  { %1765 = vsyncadd [#allocation4], 4294967040 }
  0x22   :  { %1766 = dma.done.wait [#allocation7], 288  }
  0x23   :  { %1767 = vsyncadd [#allocation7], 4294967008 }
  0x24   :  { %1768 = dma.done.wait [#allocation10], 144  }
  0x25   :  { %1769 = vsyncadd [#allocation10], 4294967152 }
  0x26   :  { %1770 = dma.done.wait [#allocation13], 48  }
  0x27   :  { %1771 = vsyncadd [#allocation13], 4294967248  ;;  %v163_v0 = vld [vmem:[#allocation3] sm:$0xff]  ;;  %v165_v1 = vld [vmem:[#allocation6] sm:$0xff]  ;;  %vm174_vm0 = vcmask 261120   ;;  %v1785_v11 = vmov 32.0  }
  0x28   :  { %v169_v2 = vld [vmem:[#allocation9] sm:$0xff]  ;;  %v167_v3 = vadd.f32 %v165_v1, %v163_v0  ;;  %v166_v5 = vld [vmem:[#allocation6 + $0x8] sm:$0xff]  ;;  %1510 = vrcp.f32 %v1785_v11  ;;  %v242_v31 = vld [vmem:[%s2266_s6] sm:$0xff]  ;;  %s1786_s22 = smov 96   ;;  %s1787_s2 = smov 112   ;;  %vm287_vm8 = vcmask 130048  }
  0x29   :  { %v164_v4 = vld [vmem:[#allocation3 + $0x8] sm:$0xff]  ;;  %v244_v29 = vld [vmem:[%s2266_s6 + $0x10] sm:$0xff]  ;;  %v243_v30 = vld [vmem:[%s2266_s6 + $0x8] sm:$0xff]  ;;  %vm338_vm9 = vcmask 64512   ;;  %s1788_s1 = smov 64   ;;  %vm418_vm10 = vcmask 261248  }
  0x2a   :  { %v170_v6 = vadd.f32 %v169_v2, %v167_v3  ;;  %v168_v7 = vadd.f32 %v166_v5, %v164_v4  ;;  %v245_v28 = vld [vmem:[%s2266_s6 + $0x18] sm:$0xff]  ;;  %v1494_v60 = vld [vmem:[%s2267_s7] ss:$0 sm:$0xff] }
  0x2b   :  { %268 = vmatpush.msra.mxu0 %v245_v28  ;;  %v1492_v46 = vld [vmem:[#allocation11] ss:$0 sm:$0xff]  ;;  %v1493_v50 = vld [vmem:[#allocation12] ss:$0 sm:$0xff] }
  0x2c   :  { %v175_v8 = vsel %vm174_vm0, %v170_v6, 0.0  ;;  %v171_v9 = vadd.f32 %v169_v2, %v168_v7  ;;  %v236_v7 = vld [vmem:[#allocation8] sm:$0x1] }
  0x2d   :  { %176 = vadd.xlane.f32.xlu0 %v175_v8  ;;  %269 = vmatpush.msra.mxu0 %v244_v29  ;;  %v238_v8 = vsub.f32 1.0, %v236_v7 }
  0x2e   :  { %v178_v10 = vsel %vm174_vm0, %v171_v9, 0.0  ;;  %v1511_v12 = vpop.eup %1510 }
  0x2f   :  { %v182_v13 = vmul.f32 32.0, %v1511_v12  ;;  %vm186_vm1 = vweird.f32 %v1511_v12  ;;  %270 = vmatpush.msra.mxu0 %v243_v30 }
  0x31   :  { %v183_v14 = vsub.f32 1.0, %v182_v13  ;;  %271 = vmatpush.msra.mxu0 %v242_v31 }
  0x33   :  { %v184_v15 = vmul.f32 %v1511_v12, %v183_v14  ;;  %v237_v14 = vld [vmem:[#allocation8 + $0x1] sm:$0x1] }
  0x35   :  { %179 = vadd.xlane.f32.xlu0 %v178_v10  ;;  %v185_v16 = vadd.f32 %v1511_v12, %v184_v15  ;;  %v239_v15 = vsub.f32 1.0, %v237_v14 }
  0x37   :  { %v1918_v17 = vsel %vm186_vm1, %v1511_v12, %v185_v16  ;;  %v241_v16 = vmul.f32 -10000.0, %v239_v15 }
  0xa0   :  { %v177_v18 = vpop.xlane.xlu0 %176 }
  0xa1   :  { %v188_v19 = vmul.f32 %v1918_v17, %v177_v18 }
  0xa3   :  { %v190_v20 = vsub.f32 %v170_v6, %v188_v19 }
  0xa5   :  { %v192_v21 = vmul.f32 %v190_v20, %v190_v20 }
  0xa7   :  { %v194_v22 = vsel %vm174_vm0, %v192_v21, 0.0 }
  0xa8   :  { %195 = vadd.xlane.f32.xlu1 %v194_v22  ;;  %v180_v23 = vpop.xlane.xlu0 %179 }
  0xa9   :  { %v189_v24 = vmul.f32 %v1918_v17, %v180_v23 }
  0xab   :  { %v191_v25 = vsub.f32 %v171_v9, %v189_v24  ;;  %v240_v9 = vmul.f32 -10000.0, %v238_v8  ;;  %v563_v8 = vld [vmem:[%s2268_s8 + $0x18] sm:$0xff] }
  0xad   :  { %v193_v26 = vmul.f32 %v191_v25, %v191_v25  ;;  %v1972_v10 = vperm.slane %v240_v9, 0  ;;  %v562_v9 = vld [vmem:[%s2268_s8 + $0x10] sm:$0xff] }
  0xaf   :  { %v197_v27 = vsel %vm174_vm0, %v193_v26, 0.0 }
  0xb0   :  { %198 = vadd.xlane.f32.xlu1 %v197_v27 }
 0x11b   :  { %v196_v32 = vpop.xlane.xlu1 %195 }
 0x11c   :  { %v200_v33 = vmul.f32 %v196_v32, %v1918_v17 }
 0x11e   :  { %v202_v34 = vadd.f32 1e-12, %v200_v33 }
 0x120   :  { %1512 = vrsqrt.f32 %v202_v34  ;;  %vm210_vm3 = vweird.f32 %v202_v34 }
 0x123   :  { %v199_v35 = vpop.xlane.xlu1 %198 }
 0x124   :  { %v201_v36 = vmul.f32 %v199_v35, %v1918_v17 }
 0x126   :  { %v1513_v37 = vpop.eup %1512  ;;  %v203_v38 = vadd.f32 1e-12, %v201_v36 }
 0x127   :  { %v205_v39 = vmul.f32 %v1513_v37, %v202_v34  ;;  %vm211_vm2 = vweird.f32 %v1513_v37 }
 0x128   :  { %1514 = vrsqrt.f32 %v203_v38  ;;  %vm212_vm4 = vmor %vm210_vm3, %vm211_vm2  ;;  %vm220_vm5 = vweird.f32 %v203_v38  ;;  %vm722_vm2 = vcmask 523264  }
 0x129   :  { %v206_v40 = vmul.f32 %v1513_v37, %v205_v39 }
 0x12b   :  { %v207_v41 = vmul.f32 0.5, %v206_v40 }
 0x12d   :  { %v208_v42 = vsub.f32 1.5, %v207_v41 }
 0x12e   :  { %v1515_v43 = vpop.eup %1514 }
 0x12f   :  { %v209_v44 = vmul.f32 %v1513_v37, %v208_v42  ;;  %v215_v45 = vmul.f32 %v1515_v43, %v203_v38  ;;  %vm221_vm6 = vweird.f32 %v1515_v43 }
 0x130   :  { %vm222_vm7 = vmor %vm220_vm5, %vm221_vm6 }
 0x131   :  { %v213_v47 = vsel %vm212_vm4, %v1513_v37, %v209_v44  ;;  %v216_v48 = vmul.f32 %v1515_v43, %v215_v45 }
 0x132   :  { %v224_v49 = vmul.f32 %v213_v47, %v190_v20  ;;  %v1977_v20 = vperm.slane %v241_v16, 0 }
 0x133   :  { %v217_v51 = vmul.f32 0.5, %v216_v48 }
 0x134   :  { %v229_v52 = vmul.f32 %v1492_v46, %v224_v49 }
 0x135   :  { %v218_v53 = vsub.f32 1.5, %v217_v51 }
 0x136   :  { %v1938_v54 = vadd.f32 %v1493_v50, %v229_v52 }
 0x137   :  { %v219_v55 = vmul.f32 %v1515_v43, %v218_v53 }
 0x138   :  { %1404 = vmatmul.msk.f32.vlgmr.msra.gmra.mxu0 %vm174_vm0, %v1938_v54 }
 0x139   :  { %v223_v56 = vsel %vm222_vm7, %v1515_v43, %v219_v55 }
 0x13a   :  { %v225_v57 = vmul.f32 %v223_v56, %v191_v25 }
 0x13c   :  { %v230_v58 = vmul.f32 %v1492_v46, %v225_v57 }
 0x13e   :  { %v1942_v59 = vadd.f32 %v1493_v50, %v230_v58 }
 0x140   :  { %1405 = vmatmul.msk.f32.gmra.mxu0 %vm174_vm0, %v1942_v59 }
 0x1b5   :  { %v273_v61 = vpop.f32.mrf.mxu0 }
 0x1b6   :  { %v274_v62 = vadd.f32 %v1494_v60, %v273_v61 }
 0x1b8   :  { %285 = vrot.lane.b32.xlu0 %v274_v62, %s1786_s22  ;;  %280 = vrot.lane.b32.xlu2 %v274_v62, %s1787_s2 }
 0x1bd   :  { %v276_v63 = vpop.f32.mrf.mxu0 }
 0x1be   :  { %v1951_v0 = vadd.f32 %v1494_v60, %v276_v63 }
 0x1c0   :  { %421 = vrot.lane.b32.xlu2 %v1951_v0, %s1787_s2 }
 0x212   :  { %v281_v1 = vpop.permute.xlu2 %280 }
 0x213   :  { %312 = vrot.lane.b32.xlu1 %v281_v1, %s1786_s22  ;;  %v1487_v31 = vpack.i.bf16 %v281_v1, %v274_v62 }
 0x21a   :  { %v1956_v2 = vpop.permute.xlu2 %421 }
 0x21b   :  { %452 = vrot.lane.b32.xlu2 %v1956_v2, %s1786_s22 }
 0x223   :  { %426 = vrot.lane.b32.xlu2 %v1951_v0, %s1786_s22 }
 0x22a   :  { %v286_v3 = vpop.permute.xlu0 %285 }
 0x22b   :  { %1406 = vmatpush.xpose.msk.msra.mxu2 %vm287_vm8, %v286_v3 }
 0x22e   :  { %1407 = vmatmul.msk.f32.vlgmr.msra.gmra.mxu2 %vm287_vm8, %v274_v62 }
 0x275   :  { %v453_v4 = vpop.permute.xlu2 %452 }
 0x27d   :  { %v427_v5 = vpop.permute.xlu2 %426 }
 0x27e   :  { %1412 = vmatpush.xpose.msk.msra.mxu1 %vm287_vm8, %v427_v5 }
 0x281   :  { %1413 = vmatmul.msk.f32.vlgmr.msra.gmra.mxu1 %vm287_vm8, %v1951_v0 }
 0x285   :  { %v313_v6 = vpop.permute.xlu1 %312 }
 0x286   :  { %1408 = vmatpush.xpose.msk.msrb.mxu2 %vm287_vm8, %v313_v6 }
 0x289   :  { %1409 = vmatmul.msk.f32.vlgmr.msrb.gmra.mxu2 %vm287_vm8, %v281_v1 }
 0x28a   :  { %1414 = vmatpush.xpose.msk.msra.mxu2 %vm287_vm8, %v453_v4 }
 0x28e   :  { %586 = vmatpush.msrb.mxu2 %v563_v8  ;;  %v715_v8 = vld [vmem:[%s2274_s14 + $0x28] sm:$0xff] }
 0x290   :  { %587 = vmatpush.msrb.mxu2 %v562_v9  ;;  %v714_v9 = vld [vmem:[%s2274_s14 + $0x20] sm:$0xff] }
 0x291   :  { %1415 = vmatmul.msk.f32.vlgmr.msra.gmra.mxu2 %vm287_vm8, %v1956_v2 }
 0x2b1   :  { %v309_v11 = vpop.f32.mrf.mxu2 }
 0x2b2   :  { %v310_v12 = vadd.f32 %v309_v11, %v1972_v10  ;;  %v561_v11 = vld [vmem:[%s2268_s8 + $0x8] sm:$0xff] }
 0x2b3   :  { %588 = vmatpush.msrb.mxu2 %v561_v11  ;;  %v713_v11 = vld [vmem:[%s2274_s14 + $0x18] sm:$0xff] }
 0x2b4   :  { %v339_v13 = vsel %vm338_vm9, %v310_v12, -inf }
 0x2b5   :  { %340 = vmax.xlane.f32.xlu2 %v339_v13 }
 0x2fe   :  { %v449_v22 = vpop.f32.mrf.mxu1 }
 0x2ff   :  { %v450_v23 = vadd.f32 %v449_v22, %v1977_v20 }
 0x301   :  { %v478_v27 = vsel %vm338_vm9, %v450_v23, -inf }
 0x30c   :  { %v335_v18 = vpop.f32.mrf.mxu2 }
 0x30d   :  { %v336_v19 = vadd.f32 %v335_v18, %v1972_v10  ;;  %v1495_v18 = vld [vmem:[%s2269_s9] ss:$0 sm:$0xff] }
 0x30f   :  { %v342_v21 = vsel %vm338_vm9, %v336_v19, -inf }
 0x310   :  { %343 = vmax.xlane.f32.xlu0 %v342_v21 }
 0x314   :  { %v475_v24 = vpop.f32.mrf.mxu2 }
 0x315   :  { %v476_v25 = vadd.f32 %v475_v24, %v1977_v20 }
 0x317   :  { %v481_v26 = vsel %vm338_vm9, %v476_v25, -inf }
 0x318   :  { %482 = vmax.xlane.f32.xlu1 %v481_v26  ;;  %479 = vmax.xlane.f32.xlu0 %v478_v27 }
 0x328   :  { %v341_v28 = vpop.xlane.xlu2 %340 }
 0x329   :  { %v345_v29 = vsub.f32 %v310_v12, %v341_v28  ;;  %v560_v12 = vld [vmem:[%s2268_s8] sm:$0xff] }
 0x32a   :  { %589 = vmatpush.msrb.mxu2 %v560_v12  ;;  %v712_v12 = vld [vmem:[%s2274_s14 + $0x10] sm:$0xff] }
 0x32b   :  { %v347_v30 = vmul.f32 1.442695, %v345_v29 }
 0x32d   :  { %1516 = vpow2.f32 %v347_v30 }
 0x331   :  { %1488 = vrot.lane.b32.xlu1 %v1487_v31, %s1788_s1 }
 0x333   :  { %v1517_v32 = vpop.eup %1516 }
 0x334   :  { %v351_v33 = vsel %vm338_vm9, %v1517_v32, 0.0 }
 0x335   :  { %352 = vadd.xlane.f32.xlu2 %v351_v33 }
 0x383   :  { %v344_v34 = vpop.xlane.xlu0 %343 }
 0x384   :  { %v346_v35 = vsub.f32 %v336_v19, %v344_v34 }
 0x386   :  { %v349_v36 = vmul.f32 1.442695, %v346_v35 }
 0x388   :  { %1518 = vpow2.f32 %v349_v36 }
 0x38b   :  { %v480_v37 = vpop.xlane.xlu0 %479  ;;  %v483_v38 = vpop.xlane.xlu1 %482 }
 0x38c   :  { %v484_v39 = vsub.f32 %v450_v23, %v480_v37  ;;  %v485_v42 = vsub.f32 %v476_v25, %v483_v38  ;;  %v657_v37 = vld [vmem:[%s2272_s12 + $0x10] sm:$0xff]  ;;  %v656_v38 = vld [vmem:[%s2272_s12 + $0x8] sm:$0xff] }
 0x38e   :  { %v1519_v40 = vpop.eup %1518  ;;  %v486_v41 = vmul.f32 1.442695, %v484_v39  ;;  %v488_v44 = vmul.f32 1.442695, %v485_v42  ;;  %v655_v39 = vld [vmem:[%s2272_s12] sm:$0xff] }
 0x38f   :  { %v354_v43 = vsel %vm338_vm9, %v1519_v40, 0.0 }
 0x390   :  { %355 = vadd.xlane.f32.xlu2 %v354_v43  ;;  %1520 = vpow2.f32 %v486_v41 }
 0x391   :  { %1522 = vpow2.f32 %v488_v44 }
 0x396   :  { %v1521_v45 = vpop.eup %1520 }
 0x397   :  { %v490_v46 = vsel %vm338_vm9, %v1521_v45, 0.0  ;;  %v1523_v47 = vpop.eup %1522 }
 0x398   :  { %491 = vadd.xlane.f32.xlu0 %v490_v46  ;;  %v493_v48 = vsel %vm338_vm9, %v1523_v47, 0.0 }
 0x3a0   :  { %494 = vadd.xlane.f32.xlu0 %v493_v48 }
 0x3a3   :  { %v1489_v49 = vpop.permute.xlu1 %1488 }
 0x3a4   :  { %v1490_v50 = vunpack.i.l.bf16 %v1489_v49  ;;  %v1491_v51 = vunpack.i.h.bf16 %v1489_v49 }
 0x3a6   :  { %382 = vmatpush.msra.mxu3 %v1490_v50 }
 0x3a8   :  { %408 = vmatpush.msrb.mxu3 %v1491_v51  ;;  %526 = vrot.lane.b32.xlu2 %v1956_v2, %s1788_s1  ;;  %v353_v52 = vpop.xlane.xlu2 %352 }
 0x3a9   :  { %1524 = vrcp.f32 %v353_v52 }
 0x3af   :  { %v1525_v53 = vpop.eup %1524 }
 0x3b0   :  { %v359_v55 = vmul.f32 %v1525_v53, %v1517_v32 }
 0x3b2   :  { %1410 = vmatmul.msk.f32.vlgmr.msra.gmra.mxu3 %vm338_vm9, %v359_v55  ;;  %v1496_v55 = vld [vmem:[%s2270_s10] ss:$0 sm:$0xff] }
 0x3b4   :  { %500 = vrot.lane.b32.xlu0 %v1951_v0, %s1788_s1 }
 0x403   :  { %v356_v56 = vpop.xlane.xlu2 %355 }
 0x404   :  { %1526 = vrcp.f32 %v356_v56 }
 0x40a   :  { %v1527_v57 = vpop.eup %1526 }
 0x40b   :  { %v527_v58 = vpop.permute.xlu2 %526  ;;  %v360_v60 = vmul.f32 %v1527_v57, %v1519_v40  ;;  %v492_v61 = vpop.xlane.xlu0 %491 }
 0x40c   :  { %547 = vmatpush.msrb.mxu1 %v527_v58 }
 0x40d   :  { %1411 = vmatmul.msk.f32.vlgmr.msrb.gmra.mxu3 %vm338_vm9, %v360_v60  ;;  %v1497_v60 = vld [vmem:[%s2271_s11] ss:$0 sm:$0xff] }
 0x413   :  { %v495_v62 = vpop.xlane.xlu0 %494 }
 0x414   :  { %1528 = vrcp.f32 %v495_v62 }
 0x415   :  { %1530 = vrcp.f32 %v492_v61 }
 0x41a   :  { %v1529_v63 = vpop.eup %1528 }
 0x41b   :  { %v499_v1 = vmul.f32 %v1529_v63, %v1523_v47  ;;  %v1531_v2 = vpop.eup %1530 }
 0x41c   :  { %v498_v3 = vmul.f32 %v1531_v2, %v1521_v45 }
 0x41d   :  { %1417 = vmatmul.msk.f32.vlgmr.msrb.gmra.mxu1 %vm338_vm9, %v499_v1 }
 0x426   :  { %v501_v4 = vpop.permute.xlu0 %500 }
 0x427   :  { %521 = vmatpush.msra.mxu3 %v501_v4 }
 0x428   :  { %1416 = vmatmul.msk.f32.vlgmr.msra.gmra.mxu3 %vm338_vm9, %v498_v3 }
 0x435   :  { %v384_v0 = vpop.f32.mrf.mxu3 }
 0x436   :  { %413 = vst.msk [vmem:[#allocation2] sm:$0xff] %vm287_vm8, %v384_v0 }
 0x490   :  { %v410_v5 = vpop.f32.mrf.mxu3 }
 0x491   :  { %415 = vrot.lane.b32.xlu1 %v410_v5, %s1781_s27 }
 0x49a   :  { %v549_v6 = vpop.f32.mrf.mxu1 }
 0x49b   :  { %554 = vrot.lane.b32.xlu2 %v549_v6, %s1781_s27  ;;  %v717_v6 = vld [vmem:[%s2274_s14 + $0x38] sm:$0xff] }
 0x49c   :  { %737 = vmatpush.msrb.mxu3 %v717_v6 }
 0x4ab   :  { %v523_v7 = vpop.f32.mrf.mxu3 }
 0x4ac   :  { %552 = vst.msk [vmem:[#allocation2 + $0x8] sm:$0xff] %vm287_vm8, %v523_v7  ;;  %v716_v7 = vld [vmem:[%s2274_s14 + $0x30] sm:$0xff] }
 0x4ad   :  { %738 = vmatpush.msrb.mxu3 %v716_v7 }
 0x4af   :  { %739 = vmatpush.msrb.mxu3 %v715_v8 }
 0x4b1   :  { %740 = vmatpush.msrb.mxu3 %v714_v9 }
 0x4b3   :  { %741 = vmatpush.msrb.mxu3 %v713_v11 }
 0x4b5   :  { %742 = vmatpush.msrb.mxu3 %v712_v12 }
 0x4f5   :  { %v555_v13 = vpop.permute.xlu2 %554 }
 0x4f6   :  { %557 = vst.msk [vmem:[#allocation2 + $0x8] sm:$0xff] %vm418_vm10, %v555_v13  ;;  %v711_v13 = vld [vmem:[%s2274_s14 + $0x8] sm:$0xff] }
 0x4f7   :  { %743 = vmatpush.msrb.mxu3 %v711_v13 }
 0x4fd   :  { %v559_v16 = vld [vmem:[#allocation2 + $0x8] sm:$0xff] }
 0x503   :  { %v416_v14 = vpop.permute.xlu1 %415 }
 0x504   :  { %419 = vst.msk [vmem:[#allocation2] sm:$0xff] %vm418_vm10, %v416_v14  ;;  %v710_v14 = vld [vmem:[%s2274_s14] sm:$0xff] }
 0x505   :  { %744 = vmatpush.msrb.mxu3 %v710_v14  ;;  %v1500_v14 = vld [vmem:[%s2276_s16] ss:$0 sm:$0xff] }
 0x50b   :  { %v558_v15 = vld [vmem:[#allocation2] sm:$0xff] }
 0x50c   :  { %1418 = vmatmul.msk.f32.vlgmr.msrb.gmra.mxu2 %vm174_vm0, %v558_v15  ;;  %v1498_v15 = vld [vmem:[%s2273_s13] ss:$0 sm:$0xff] }
 0x514   :  { %1419 = vmatmul.msk.f32.gmra.mxu2 %vm174_vm0, %v559_v16 }
 0x58f   :  { %v591_v19 = vpop.f32.mrf.mxu2 }
 0x590   :  { %v592_v21 = vadd.f32 %v1495_v18, %v591_v19 }
 0x592   :  { %v597_v22 = vadd.f32 %v592_v21, %v1938_v54 }
 0x594   :  { %v601_v23 = vsel %vm174_vm0, %v597_v22, 0.0 }
 0x595   :  { %602 = vadd.xlane.f32.xlu1 %v601_v23 }
 0x597   :  { %v594_v24 = vpop.f32.mrf.mxu2 }
 0x598   :  { %v595_v25 = vadd.f32 %v1495_v18, %v594_v24 }
 0x59a   :  { %v598_v26 = vadd.f32 %v595_v25, %v1942_v59  ;;  %v658_v59 = vld [vmem:[%s2272_s12 + $0x18] sm:$0xff] }
 0x59b   :  { %681 = vmatpush.msrb.mxu0 %v658_v59 }
 0x59c   :  { %v604_v27 = vsel %vm174_vm0, %v598_v26, 0.0 }
 0x59d   :  { %605 = vadd.xlane.f32.xlu2 %v604_v27  ;;  %682 = vmatpush.msrb.mxu0 %v657_v37 }
 0x59f   :  { %683 = vmatpush.msrb.mxu0 %v656_v38  ;;  %v1499_v38 = vld [vmem:[%s2275_s15] ss:$0 sm:$0xff] }
 0x5a1   :  { %684 = vmatpush.msrb.mxu0 %v655_v39 }
 0x608   :  { %v603_v28 = vpop.xlane.xlu1 %602 }
 0x609   :  { %v607_v29 = vmul.f32 %v603_v28, %v1918_v17 }
 0x60b   :  { %v609_v30 = vsub.f32 %v597_v22, %v607_v29 }
 0x60d   :  { %v611_v31 = vmul.f32 %v609_v30, %v609_v30 }
 0x60f   :  { %v613_v32 = vsel %vm174_vm0, %v611_v31, 0.0 }
 0x610   :  { %614 = vadd.xlane.f32.xlu0 %v613_v32  ;;  %v606_v33 = vpop.xlane.xlu2 %605 }
 0x611   :  { %v608_v54 = vmul.f32 %v606_v33, %v1918_v17 }
 0x613   :  { %v610_v34 = vsub.f32 %v598_v26, %v608_v54 }
 0x615   :  { %v612_v35 = vmul.f32 %v610_v34, %v610_v34 }
 0x617   :  { %v616_v36 = vsel %vm174_vm0, %v612_v35, 0.0 }
 0x618   :  { %617 = vadd.xlane.f32.xlu1 %v616_v36 }
 0x683   :  { %v615_v40 = vpop.xlane.xlu0 %614 }
 0x684   :  { %v619_v41 = vmul.f32 %v615_v40, %v1918_v17 }
 0x686   :  { %v621_v42 = vadd.f32 1e-12, %v619_v41 }
 0x688   :  { %1532 = vrsqrt.f32 %v621_v42  ;;  %vm629_vm12 = vweird.f32 %v621_v42 }
 0x68b   :  { %v618_v43 = vpop.xlane.xlu1 %617 }
 0x68c   :  { %v620_v44 = vmul.f32 %v618_v43, %v1918_v17 }
 0x68e   :  { %v1533_v45 = vpop.eup %1532  ;;  %v622_v46 = vadd.f32 1e-12, %v620_v44 }
 0x68f   :  { %v624_v47 = vmul.f32 %v1533_v45, %v621_v42  ;;  %vm630_vm11 = vweird.f32 %v1533_v45 }
 0x690   :  { %1534 = vrsqrt.f32 %v622_v46  ;;  %vm631_vm13 = vmor %vm629_vm12, %vm630_vm11  ;;  %vm639_vm15 = vweird.f32 %v622_v46 }
 0x691   :  { %v625_v48 = vmul.f32 %v1533_v45, %v624_v47 }
 0x693   :  { %v626_v49 = vmul.f32 0.5, %v625_v48 }
 0x695   :  { %v627_v50 = vsub.f32 1.5, %v626_v49 }
 0x696   :  { %v1535_v51 = vpop.eup %1534 }
 0x697   :  { %v628_v52 = vmul.f32 %v1533_v45, %v627_v50  ;;  %v634_v53 = vmul.f32 %v1535_v51, %v622_v46  ;;  %vm640_vm14 = vweird.f32 %v1535_v51 }
 0x698   :  { %vm641_vm1 = vmor %vm639_vm15, %vm640_vm14 }
 0x699   :  { %v632_v56 = vsel %vm631_vm13, %v1533_v45, %v628_v52  ;;  %v635_v57 = vmul.f32 %v1535_v51, %v634_v53 }
 0x69a   :  { %v643_v58 = vmul.f32 %v632_v56, %v609_v30 }
 0x69b   :  { %v636_v61 = vmul.f32 0.5, %v635_v57 }
 0x69c   :  { %v648_v62 = vmul.f32 %v1496_v55, %v643_v58  ;;  %v1427_v58 = vld [vmem:[%s2266_s6 + $0x38] sm:$0xff] }
 0x69d   :  { %v637_v63 = vsub.f32 1.5, %v636_v61  ;;  %838 = vmatpush.msra.mxu1 %v1427_v58  ;;  %v1425_v61 = vld [vmem:[%s2266_s6 + $0x28] sm:$0xff] }
 0x69e   :  { %v653_v1 = vadd.f32 %v1497_v60, %v648_v62  ;;  %v1424_v62 = vld [vmem:[%s2266_s6 + $0x20] sm:$0xff] }
 0x69f   :  { %v638_v2 = vmul.f32 %v1535_v51, %v637_v63 }
 0x6a0   :  { %1420 = vmatmul.msk.f32.vlgmr.msrb.gmra.mxu0 %vm174_vm0, %v653_v1 }
 0x6a1   :  { %v642_v3 = vsel %vm641_vm1, %v1535_v51, %v638_v2 }
 0x6a2   :  { %v644_v4 = vmul.f32 %v642_v3, %v610_v34 }
 0x6a4   :  { %v649_v0 = vmul.f32 %v1496_v55, %v644_v4 }
 0x6a6   :  { %v654_v5 = vadd.f32 %v1497_v60, %v649_v0  ;;  %v1426_v60 = vld [vmem:[%s2266_s6 + $0x30] sm:$0xff]  ;;  %s2292_s6 = sld [smem:[#allocation24_spill]] }
 0x6a7   :  { %839 = vmatpush.msra.mxu1 %v1426_v60 }
 0x6a8   :  { %1421 = vmatmul.msk.f32.gmra.mxu0 %vm174_vm0, %v654_v5 }
 0x6a9   :  { %840 = vmatpush.msra.mxu1 %v1425_v61 }
 0x6ab   :  { %841 = vmatpush.msra.mxu1 %v1424_v62 }
 0x6ac   :  { %s1388_s21 = sshll.u32 %s2292_s6, 4  ;;  %s1389_s21 = int_to_ptr.hbm [resolvable:$true] %s1388_s21 }
 0x71d   :  { %v686_v16 = vpop.f32.mrf.mxu0 }
 0x71e   :  { %v687_v18 = vadd.f32 %v1498_v15, %v686_v16 }
 0x720   :  { %v692_v19 = vmul.f32 %v687_v18, %v687_v18 }
 0x722   :  { %v694_v21 = vmul.f32 %v692_v19, %v687_v18  ;;  %v1501_v19 = vld [vmem:[#allocation14] ss:$0 sm:$0xff] }
 0x724   :  { %v696_v22 = vmul.f32 0.044715, %v694_v21 }
 0x725   :  { %v689_v23 = vpop.f32.mrf.mxu0 }
 0x726   :  { %v698_v24 = vadd.f32 %v696_v22, %v687_v18  ;;  %v690_v25 = vadd.f32 %v1498_v15, %v689_v23 }
 0x728   :  { %v700_v26 = vmul.f32 0.7978846, %v698_v24  ;;  %v693_v27 = vmul.f32 %v690_v25, %v690_v25 }
 0x72a   :  { %1536 = vtanh.f32 %v700_v26  ;;  %v695_v28 = vmul.f32 %v693_v27, %v690_v25 }
 0x72c   :  { %v697_v29 = vmul.f32 0.044715, %v695_v28 }
 0x72e   :  { %v699_v30 = vadd.f32 %v697_v29, %v690_v25 }
 0x730   :  { %v1537_v31 = vpop.eup %1536  ;;  %v701_v32 = vmul.f32 0.7978846, %v699_v30  ;;  %v1502_v30 = vld [vmem:[%s2267_s7 + $0x1] ss:$0 sm:$0xff] }
 0x731   :  { %v704_v33 = vadd.f32 1.0, %v1537_v31 }
 0x732   :  { %1538 = vtanh.f32 %v701_v32 }
 0x733   :  { %v706_v54 = vmul.f32 0.5, %v704_v33 }
 0x735   :  { %v708_v34 = vmul.f32 %v706_v54, %v687_v18 }
 0x737   :  { %1422 = vmatmul.msk.f32.vlgmr.msrb.gmra.mxu3 %vm722_vm2, %v708_v34 }
 0x738   :  { %v1539_v35 = vpop.eup %1538 }
 0x739   :  { %v705_v36 = vadd.f32 1.0, %v1539_v35 }
 0x73b   :  { %v707_v59 = vmul.f32 0.5, %v705_v36 }
 0x73d   :  { %v709_v37 = vmul.f32 %v707_v59, %v690_v25 }
 0x73f   :  { %1423 = vmatmul.msk.f32.gmra.mxu3 %vm722_vm2, %v709_v37 }
 0x7ba   :  { %v746_v39 = vpop.f32.mrf.mxu3 }
 0x7bb   :  { %v747_v40 = vadd.f32 %v1499_v38, %v746_v39 }
 0x7bd   :  { %v752_v41 = vadd.f32 %v747_v40, %v653_v1 }
 0x7bf   :  { %v756_v42 = vsel %vm174_vm0, %v752_v41, 0.0 }
 0x7c0   :  { %757 = vadd.xlane.f32.xlu2 %v756_v42 }
 0x7c2   :  { %v749_v43 = vpop.f32.mrf.mxu3 }
 0x7c3   :  { %v750_v44 = vadd.f32 %v1499_v38, %v749_v43 }
 0x7c5   :  { %v753_v45 = vadd.f32 %v750_v44, %v654_v5 }
 0x7c7   :  { %v759_v46 = vsel %vm174_vm0, %v753_v45, 0.0 }
 0x7c8   :  { %760 = vadd.xlane.f32.xlu0 %v759_v46 }
 0x833   :  { %v758_v47 = vpop.xlane.xlu2 %757 }
 0x834   :  { %v762_v48 = vmul.f32 %v758_v47, %v1918_v17 }
 0x836   :  { %v764_v49 = vsub.f32 %v752_v41, %v762_v48 }
 0x838   :  { %v766_v50 = vmul.f32 %v764_v49, %v764_v49 }
 0x83a   :  { %v768_v51 = vsel %vm174_vm0, %v766_v50, 0.0 }
 0x83b   :  { %v761_v52 = vpop.xlane.xlu0 %760  ;;  %769 = vadd.xlane.f32.xlu1 %v768_v51 }
 0x83c   :  { %v763_v53 = vmul.f32 %v761_v52, %v1918_v17 }
 0x83e   :  { %v765_v55 = vsub.f32 %v753_v45, %v763_v53 }
 0x840   :  { %v767_v56 = vmul.f32 %v765_v55, %v765_v55 }
 0x842   :  { %v771_v57 = vsel %vm174_vm0, %v767_v56, 0.0 }
 0x843   :  { %772 = vadd.xlane.f32.xlu2 %v771_v57 }
 0x8ae   :  { %v770_v63 = vpop.xlane.xlu1 %769 }
 0x8af   :  { %v774_v1 = vmul.f32 %v770_v63, %v1918_v17 }
 0x8b1   :  { %v776_v2 = vadd.f32 1e-12, %v774_v1 }
 0x8b3   :  { %1540 = vrsqrt.f32 %v776_v2  ;;  %vm784_vm4 = vweird.f32 %v776_v2 }
 0x8b6   :  { %v773_v3 = vpop.xlane.xlu2 %772 }
 0x8b7   :  { %v775_v4 = vmul.f32 %v773_v3, %v1918_v17 }
 0x8b9   :  { %v1541_v0 = vpop.eup %1540  ;;  %v777_v5 = vadd.f32 1e-12, %v775_v4 }
 0x8ba   :  { %v779_v6 = vmul.f32 %v1541_v0, %v776_v2  ;;  %vm785_vm3 = vweird.f32 %v1541_v0 }
 0x8bb   :  { %1542 = vrsqrt.f32 %v777_v5  ;;  %vm786_vm5 = vmor %vm784_vm4, %vm785_vm3  ;;  %vm794_vm7 = vweird.f32 %v777_v5 }
 0x8bc   :  { %v780_v7 = vmul.f32 %v1541_v0, %v779_v6 }
 0x8be   :  { %v781_v8 = vmul.f32 0.5, %v780_v7 }
 0x8c0   :  { %v782_v9 = vsub.f32 1.5, %v781_v8 }
 0x8c1   :  { %v1543_v11 = vpop.eup %1542 }
 0x8c2   :  { %v783_v12 = vmul.f32 %v1541_v0, %v782_v9  ;;  %v789_v13 = vmul.f32 %v1543_v11, %v777_v5  ;;  %vm795_vm6 = vweird.f32 %v1543_v11 }
 0x8c3   :  { %vm796_vm11 = vmor %vm794_vm7, %vm795_vm6 }
 0x8c4   :  { %v787_v15 = vsel %vm786_vm5, %v1541_v0, %v783_v12  ;;  %v790_v16 = vmul.f32 %v1543_v11, %v789_v13 }
 0x8c5   :  { %v798_v18 = vmul.f32 %v787_v15, %v764_v49 }
 0x8c6   :  { %v791_v21 = vmul.f32 0.5, %v790_v16 }
 0x8c7   :  { %v803_v22 = vmul.f32 %v1500_v14, %v798_v18 }
 0x8c8   :  { %v792_v23 = vsub.f32 1.5, %v791_v21 }
 0x8c9   :  { %v2105_v24 = vadd.f32 %v1501_v19, %v803_v22 }
 0x8ca   :  { %v793_v25 = vmul.f32 %v1543_v11, %v792_v23 }
 0x8cb   :  { %1429 = vmatmul.msk.f32.vlgmr.msra.gmra.mxu1 %vm174_vm0, %v2105_v24 }
 0x8cc   :  { %v797_v26 = vsel %vm796_vm11, %v1543_v11, %v793_v25 }
 0x8cd   :  { %v799_v27 = vmul.f32 %v797_v26, %v765_v55 }
 0x8cf   :  { %v804_v28 = vmul.f32 %v1500_v14, %v799_v27 }
 0x8d1   :  { %v2109_v29 = vadd.f32 %v1501_v19, %v804_v28 }
 0x8d3   :  { %1430 = vmatmul.msk.f32.gmra.mxu1 %vm174_vm0, %v2109_v29 }
 0x948   :  { %v843_v31 = vpop.f32.mrf.mxu1 }
 0x949   :  { %v2116_v32 = vadd.f32 %v1502_v30, %v843_v31 }
 0x94b   :  { %850 = vrot.lane.b32.xlu0 %v2116_v32, %s1787_s2 }
 0x950   :  { %v846_v33 = vpop.f32.mrf.mxu1 }
 0x951   :  { %v847_v54 = vadd.f32 %v1502_v30, %v846_v33  ;;  %v1445_v33 = vld [vmem:[%s2268_s8 + $0x30] sm:$0xff] }
 0x953   :  { %985 = vrot.lane.b32.xlu1 %v847_v54, %s1787_s2 }
 0x95b   :  { %852 = vrot.lane.b32.xlu1 %v2116_v32, %s1786_s22 }
 0x9bd   :  { %v851_v34 = vpop.permute.xlu0 %850 }
 0x9be   :  { %878 = vrot.lane.b32.xlu2 %v851_v34, %s1786_s22 }
 0x9c5   :  { %v986_v35 = vpop.permute.xlu1 %985 }
 0x9c6   :  { %1013 = vrot.lane.b32.xlu0 %v986_v35, %s1786_s22 }
 0x9cd   :  { %v853_v36 = vpop.permute.xlu1 %852 }
 0x9ce   :  { %1431 = vmatpush.xpose.msk.msra.mxu2 %vm287_vm8, %v853_v36  ;;  %987 = vrot.lane.b32.xlu0 %v847_v54, %s1786_s22 }
 0x9d1   :  { %1432 = vmatmul.msk.f32.vlgmr.msra.gmra.mxu2 %vm287_vm8, %v2116_v32 }
 0xa18   :  { %v879_v59 = vpop.permute.xlu2 %878 }
 0xa19   :  { %1433 = vmatpush.xpose.msk.msra.mxu0 %vm287_vm8, %v879_v59 }
 0xa1c   :  { %1434 = vmatmul.msk.f32.vlgmr.msra.gmra.mxu0 %vm287_vm8, %v851_v34 }
 0xa38   :  { %v1014_v37 = vpop.permute.xlu0 %1013 }
 0xa39   :  { %1439 = vmatpush.xpose.msk.msra.mxu3 %vm287_vm8, %v1014_v37 }
 0xa3c   :  { %1440 = vmatmul.msk.f32.vlgmr.msra.gmra.mxu3 %vm287_vm8, %v986_v35 }
 0xa40   :  { %v988_v38 = vpop.permute.xlu0 %987 }
 0xa41   :  { %1437 = vmatpush.xpose.msk.msrb.mxu0 %vm287_vm8, %v988_v38  ;;  %v1503_v38 = vld [vmem:[%s2269_s9 + $0x1] ss:$0 sm:$0xff] }
 0xa44   :  { %1438 = vmatmul.msk.f32.vlgmr.msrb.gmra.mxu0 %vm287_vm8, %v847_v54 }
 0xa54   :  { %v875_v39 = vpop.f32.mrf.mxu2 }
 0xa55   :  { %v876_v40 = vadd.f32 %v875_v39, %v1972_v10 }
 0xa57   :  { %v904_v41 = vsel %vm338_vm9, %v876_v40, -inf }
 0xa58   :  { %905 = vmax.xlane.f32.xlu0 %v904_v41 }
 0xa99   :  { %v901_v42 = vpop.f32.mrf.mxu0 }
 0xa9a   :  { %v902_v43 = vadd.f32 %v901_v42, %v1972_v10 }
 0xa9c   :  { %v907_v44 = vsel %vm338_vm9, %v902_v43, -inf }
 0xa9d   :  { %908 = vmax.xlane.f32.xlu2 %v907_v44 }
 0xabf   :  { %v1036_v45 = vpop.f32.mrf.mxu3 }
 0xac0   :  { %v1037_v46 = vadd.f32 %v1036_v45, %v1977_v20 }
 0xac1   :  { %v1010_v48 = vpop.f32.mrf.mxu0 }
 0xac2   :  { %v1042_v47 = vsel %vm338_vm9, %v1037_v46, -inf  ;;  %v1011_v49 = vadd.f32 %v1010_v48, %v1977_v20 }
 0xac3   :  { %1043 = vmax.xlane.f32.xlu1 %v1042_v47 }
 0xac4   :  { %v1039_v50 = vsel %vm338_vm9, %v1011_v49, -inf }
 0xacb   :  { %v906_v51 = vpop.xlane.xlu0 %905  ;;  %1040 = vmax.xlane.f32.xlu1 %v1039_v50 }
 0xacc   :  { %v910_v52 = vsub.f32 %v876_v40, %v906_v51 }
 0xace   :  { %v912_v53 = vmul.f32 1.442695, %v910_v52 }
 0xad0   :  { %1544 = vpow2.f32 %v912_v53 }
 0xad6   :  { %v1545_v10 = vpop.eup %1544 }
 0xad7   :  { %v916_v55 = vsel %vm338_vm9, %v1545_v10, 0.0 }
 0xad8   :  { %917 = vadd.xlane.f32.xlu0 %v916_v55 }
 0xae4   :  { %1087 = vrot.lane.b32.xlu1 %v986_v35, %s1788_s1 }
 0xb10   :  { %v909_v56 = vpop.xlane.xlu2 %908 }
 0xb11   :  { %v911_v57 = vsub.f32 %v902_v43, %v909_v56  ;;  %v1454_v56 = vld [vmem:[%s2272_s12 + $0x30] sm:$0xff] }
 0xb13   :  { %v914_v58 = vmul.f32 1.442695, %v911_v57  ;;  %v1453_v57 = vld [vmem:[%s2272_s12 + $0x28] sm:$0xff] }
 0xb15   :  { %1546 = vpow2.f32 %v914_v58  ;;  %v1452_v58 = vld [vmem:[%s2272_s12 + $0x20] sm:$0xff] }
 0xb1b   :  { %v1547_v60 = vpop.eup %1546 }
 0xb1c   :  { %v919_v20 = vsel %vm338_vm9, %v1547_v60, 0.0 }
 0xb1d   :  { %920 = vadd.xlane.f32.xlu2 %v919_v20 }
 0xb35   :  { %952 = vrot.lane.b32.xlu2 %v851_v34, %s1788_s1  ;;  %v1443_v34 = vld [vmem:[%s2268_s8 + $0x20] sm:$0xff] }
 0xb36   :  { %v1044_v61 = vpop.xlane.xlu1 %1043 }
 0xb37   :  { %v1046_v62 = vsub.f32 %v1037_v46, %v1044_v61 }
 0xb39   :  { %v1049_v63 = vmul.f32 1.442695, %v1046_v62 }
 0xb3b   :  { %1548 = vpow2.f32 %v1049_v63 }
 0xb3d   :  { %1061 = vrot.lane.b32.xlu2 %v847_v54, %s1788_s1  ;;  %v1444_v54 = vld [vmem:[%s2268_s8 + $0x28] sm:$0xff] }
 0xb3e   :  { %v1041_v1 = vpop.xlane.xlu1 %1040 }
 0xb3f   :  { %v1045_v2 = vsub.f32 %v1011_v49, %v1041_v1 }
 0xb41   :  { %v1549_v3 = vpop.eup %1548  ;;  %v1047_v4 = vmul.f32 1.442695, %v1045_v2 }
 0xb42   :  { %v1054_v0 = vsel %vm338_vm9, %v1549_v3, 0.0 }
 0xb43   :  { %1550 = vpow2.f32 %v1047_v4  ;;  %1055 = vadd.xlane.f32.xlu0 %v1054_v0 }
 0xb49   :  { %v1551_v5 = vpop.eup %1550 }
 0xb4a   :  { %v1051_v6 = vsel %vm338_vm9, %v1551_v5, 0.0 }
 0xb4b   :  { %1052 = vadd.xlane.f32.xlu0 %v1051_v6  ;;  %v918_v13 = vpop.xlane.xlu0 %917 }
 0xb56   :  { %v1088_v12 = vpop.permute.xlu1 %1087 }
 0xb5f   :  { %926 = vrot.lane.b32.xlu0 %v2116_v32, %s1788_s1  ;;  %v1446_v32 = vld [vmem:[%s2268_s8 + $0x38] sm:$0xff] }
 0xb60   :  { %1149 = vmatpush.msra.mxu0 %v1446_v32  ;;  %v1462_v32 = vld [vmem:[%s2274_s14 + $0x58] sm:$0xff] }
 0xb62   :  { %1150 = vmatpush.msra.mxu0 %v1445_v33  ;;  %v1461_v33 = vld [vmem:[%s2274_s14 + $0x50] sm:$0xff] }
 0xb64   :  { %1151 = vmatpush.msra.mxu0 %v1444_v54  ;;  %v1460_v54 = vld [vmem:[%s2274_s14 + $0x48] sm:$0xff] }
 0xb66   :  { %1152 = vmatpush.msra.mxu0 %v1443_v34  ;;  %v1459_v34 = vld [vmem:[%s2274_s14 + $0x40] sm:$0xff] }
 0xb90   :  { %v921_v7 = vpop.xlane.xlu2 %920 }
 0xb91   :  { %1552 = vrcp.f32 %v921_v7  ;;  %v1504_v7 = vld [vmem:[%s2270_s10 + $0x1] ss:$0 sm:$0xff] }
 0xb97   :  { %v1553_v8 = vpop.eup %1552 }
 0xb98   :  { %v925_v9 = vmul.f32 %v1553_v8, %v1547_v60  ;;  %v953_v11 = vpop.permute.xlu2 %952 }
 0xb99   :  { %973 = vmatpush.msrb.mxu2 %v953_v11  ;;  %v1505_v11 = vld [vmem:[%s2271_s11 + $0x1] ss:$0 sm:$0xff] }
 0xb9a   :  { %1436 = vmatmul.msk.f32.vlgmr.msrb.gmra.mxu2 %vm338_vm9, %v925_v9 }
 0xb9b   :  { %1108 = vmatpush.msra.mxu2 %v1088_v12 }
 0xba0   :  { %v1062_v23 = vpop.permute.xlu2 %1061 }
 0xbb6   :  { %v1056_v14 = vpop.xlane.xlu0 %1055 }
 0xbb7   :  { %1554 = vrcp.f32 %v1056_v14 }
 0xbb8   :  { %1556 = vrcp.f32 %v918_v13 }
 0xbbd   :  { %v1555_v15 = vpop.eup %1554 }
 0xbbe   :  { %v1060_v16 = vmul.f32 %v1555_v15, %v1549_v3  ;;  %v1053_v18 = vpop.xlane.xlu0 %1052  ;;  %v1557_v19 = vpop.eup %1556 }
 0xbbf   :  { %1558 = vrcp.f32 %v1053_v18  ;;  %v924_v21 = vmul.f32 %v1557_v19, %v1545_v10 }
 0xbc0   :  { %1442 = vmatmul.msk.f32.vlgmr.msra.gmra.mxu2 %vm338_vm9, %v1060_v16 }
 0xbc5   :  { %v1559_v25 = vpop.eup %1558 }
 0xbc6   :  { %v1059_v26 = vmul.f32 %v1559_v25, %v1551_v5 }
 0xbd1   :  { %v927_v22 = vpop.permute.xlu0 %926 }
 0xbd2   :  { %947 = vmatpush.msrb.mxu1 %v927_v22 }
 0xbd3   :  { %1435 = vmatmul.msk.f32.vlgmr.msrb.gmra.mxu1 %vm338_vm9, %v924_v21 }
 0xbd4   :  { %1082 = vmatpush.msra.mxu1 %v1062_v23 }
 0xbdb   :  { %1441 = vmatmul.msk.f32.vlgmr.msra.gmra.mxu1 %vm338_vm9, %v1059_v26 }
 0xc1d   :  { %v975_v27 = vpop.f32.mrf.mxu2 }
 0xc1e   :  { %980 = vrot.lane.b32.xlu1 %v975_v27, %s1781_s27  ;;  %v1466_v27 = vld [vmem:[%s2274_s14 + $0x78] sm:$0xff] }
 0xc1f   :  { %1305 = vmatpush.msrb.mxu1 %v1466_v27 }
 0xc43   :  { %v1110_v28 = vpop.f32.mrf.mxu2 }
 0xc44   :  { %1115 = vrot.lane.b32.xlu2 %v1110_v28, %s1781_s27  ;;  %v1465_v28 = vld [vmem:[%s2274_s14 + $0x70] sm:$0xff] }
 0xc45   :  { %1306 = vmatpush.msrb.mxu1 %v1465_v28 }
 0xc50   :  { %v949_v30 = vpop.f32.mrf.mxu1 }
 0xc51   :  { %978 = vst.msk [vmem:[#allocation2] sm:$0xff] %vm287_vm8, %v949_v30  ;;  %v1464_v30 = vld [vmem:[%s2274_s14 + $0x68] sm:$0xff] }
 0xc52   :  { %1307 = vmatpush.msrb.mxu1 %v1464_v30  ;;  %v1509_v30 = vld [vmem:[#allocation14 + $0x1] ss:$0 sm:$0xff] }
 0xc58   :  { %v1084_v31 = vpop.f32.mrf.mxu1 }
 0xc59   :  { %1113 = vst.msk [vmem:[#allocation2 + $0x8] sm:$0xff] %vm287_vm8, %v1084_v31  ;;  %v1463_v31 = vld [vmem:[%s2274_s14 + $0x60] sm:$0xff] }
 0xc5a   :  { %1308 = vmatpush.msrb.mxu1 %v1463_v31 }
 0xc5c   :  { %1309 = vmatpush.msrb.mxu1 %v1462_v32 }
 0xc5e   :  { %1310 = vmatpush.msrb.mxu1 %v1461_v33 }
 0xc60   :  { %1311 = vmatpush.msrb.mxu1 %v1460_v54 }
 0xc62   :  { %1312 = vmatpush.msrb.mxu1 %v1459_v34 }
 0xc90   :  { %v981_v35 = vpop.permute.xlu1 %980 }
 0xc91   :  { %983 = vst.msk [vmem:[#allocation2] sm:$0xff] %vm418_vm10, %v981_v35  ;;  %v1506_v35 = vld [vmem:[%s2273_s13 + $0x1] ss:$0 sm:$0xff] }
 0xc98   :  { %v1119_v36 = vld [vmem:[#allocation2] sm:$0xff] }
 0xc99   :  { %1448 = vmatmul.msk.f32.vlgmr.msra.gmra.mxu0 %vm174_vm0, %v1119_v36 }
 0xc9e   :  { %v1116_v59 = vpop.permute.xlu2 %1115 }
 0xc9f   :  { %1118 = vst.msk [vmem:[#allocation2 + $0x8] sm:$0xff] %vm418_vm10, %v1116_v59 }
 0xca6   :  { %v1120_v37 = vld [vmem:[#allocation2 + $0x8] sm:$0xff] }
 0xca7   :  { %1449 = vmatmul.msk.f32.gmra.mxu0 %vm174_vm0, %v1120_v37 }
 0xd16   :  { %v1154_v39 = vpop.f32.mrf.mxu0 }
 0xd17   :  { %v1155_v40 = vadd.f32 %v1503_v38, %v1154_v39 }
 0xd19   :  { %v1160_v41 = vadd.f32 %v1155_v40, %v2105_v24 }
 0xd1b   :  { %v1166_v42 = vsel %vm174_vm0, %v1160_v41, 0.0 }
 0xd1c   :  { %1167 = vadd.xlane.f32.xlu1 %v1166_v42 }
 0xd24   :  { %v1157_v43 = vpop.f32.mrf.mxu0 }
 0xd25   :  { %v1158_v44 = vadd.f32 %v1503_v38, %v1157_v43 }
 0xd27   :  { %v1161_v45 = vadd.f32 %v1158_v44, %v2109_v29  ;;  %v1455_v29 = vld [vmem:[%s2272_s12 + $0x38] sm:$0xff] }
 0xd28   :  { %1248 = vmatpush.msrb.mxu3 %v1455_v29  ;;  %v1507_v29 = vld [vmem:[%s2275_s15 + $0x1] ss:$0 sm:$0xff] }
 0xd29   :  { %v1169_v46 = vsel %vm174_vm0, %v1161_v45, 0.0 }
 0xd2a   :  { %1170 = vadd.xlane.f32.xlu2 %v1169_v46  ;;  %1249 = vmatpush.msrb.mxu3 %v1454_v56 }
 0xd2c   :  { %1250 = vmatpush.msrb.mxu3 %v1453_v57 }
 0xd2e   :  { %1251 = vmatpush.msrb.mxu3 %v1452_v58 }
 0xd8f   :  { %v1168_v47 = vpop.xlane.xlu1 %1167 }
 0xd90   :  { %v1172_v48 = vmul.f32 %v1168_v47, %v1918_v17 }
 0xd92   :  { %v1174_v49 = vsub.f32 %v1160_v41, %v1172_v48 }
 0xd94   :  { %v1176_v50 = vmul.f32 %v1174_v49, %v1174_v49 }
 0xd96   :  { %v1178_v51 = vsel %vm174_vm0, %v1176_v50, 0.0 }
 0xd97   :  { %1179 = vadd.xlane.f32.xlu0 %v1178_v51 }
 0xd9d   :  { %v1171_v52 = vpop.xlane.xlu2 %1170 }
 0xd9e   :  { %v1173_v24 = vmul.f32 %v1171_v52, %v1918_v17 }
 0xda0   :  { %v1175_v53 = vsub.f32 %v1161_v45, %v1173_v24 }
 0xda2   :  { %v1177_v10 = vmul.f32 %v1175_v53, %v1175_v53 }
 0xda4   :  { %v1181_v55 = vsel %vm174_vm0, %v1177_v10, 0.0 }
 0xda5   :  { %1182 = vadd.xlane.f32.xlu1 %v1181_v55 }
 0xe0a   :  { %v1180_v60 = vpop.xlane.xlu0 %1179 }
 0xe0b   :  { %v1184_v20 = vmul.f32 %v1180_v60, %v1918_v17 }
 0xe0d   :  { %v1186_v61 = vadd.f32 1e-12, %v1184_v20 }
 0xe0f   :  { %1560 = vrsqrt.f32 %v1186_v61  ;;  %vm1194_vm9 = vweird.f32 %v1186_v61 }
 0xe15   :  { %v1561_v62 = vpop.eup %1560 }
 0xe16   :  { %v1189_v63 = vmul.f32 %v1561_v62, %v1186_v61  ;;  %vm1195_vm8 = vweird.f32 %v1561_v62 }
 0xe17   :  { %vm1196_vm10 = vmor %vm1194_vm9, %vm1195_vm8 }
 0xe18   :  { %v1190_v1 = vmul.f32 %v1561_v62, %v1189_v63  ;;  %v1183_v2 = vpop.xlane.xlu1 %1182 }
 0xe19   :  { %v1185_v3 = vmul.f32 %v1183_v2, %v1918_v17 }
 0xe1a   :  { %v1191_v4 = vmul.f32 0.5, %v1190_v1 }
 0xe1b   :  { %v1187_v0 = vadd.f32 1e-12, %v1185_v3 }
 0xe1c   :  { %v1192_v5 = vsub.f32 1.5, %v1191_v4 }
 0xe1d   :  { %1562 = vrsqrt.f32 %v1187_v0  ;;  %vm1204_vm13 = vweird.f32 %v1187_v0 }
 0xe1e   :  { %v1193_v6 = vmul.f32 %v1561_v62, %v1192_v5 }
 0xe20   :  { %v1197_v8 = vsel %vm1196_vm10, %v1561_v62, %v1193_v6 }
 0xe21   :  { %v1208_v9 = vmul.f32 %v1197_v8, %v1174_v49 }
 0xe23   :  { %v1563_v12 = vpop.eup %1562  ;;  %v1213_v13 = vmul.f32 %v1504_v7, %v1208_v9 }
 0xe24   :  { %v1199_v14 = vmul.f32 %v1563_v12, %v1187_v0  ;;  %vm1205_vm12 = vweird.f32 %v1563_v12 }
 0xe25   :  { %v1218_v15 = vadd.f32 %v1505_v11, %v1213_v13  ;;  %vm1206_vm14 = vmor %vm1204_vm13, %vm1205_vm12 }
 0xe26   :  { %v1200_v16 = vmul.f32 %v1563_v12, %v1199_v14 }
 0xe27   :  { %1457 = vmatmul.msk.f32.vlgmr.msrb.gmra.mxu3 %vm174_vm0, %v1218_v15 }
 0xe28   :  { %v1201_v18 = vmul.f32 0.5, %v1200_v16 }
 0xe2a   :  { %v1202_v19 = vsub.f32 1.5, %v1201_v18 }
 0xe2c   :  { %v1203_v21 = vmul.f32 %v1563_v12, %v1202_v19 }
 0xe2e   :  { %v1207_v22 = vsel %vm1206_vm14, %v1563_v12, %v1203_v21 }
 0xe2f   :  { %v1209_v23 = vmul.f32 %v1207_v22, %v1175_v53 }
 0xe31   :  { %v1214_v25 = vmul.f32 %v1504_v7, %v1209_v23 }
 0xe33   :  { %v1219_v26 = vadd.f32 %v1505_v11, %v1214_v25 }
 0xe35   :  { %1458 = vmatmul.msk.f32.gmra.mxu3 %vm174_vm0, %v1219_v26 }
 0xeaa   :  { %v1253_v36 = vpop.f32.mrf.mxu3 }
 0xeab   :  { %v1254_v59 = vadd.f32 %v1506_v35, %v1253_v36 }
 0xead   :  { %v1259_v37 = vmul.f32 %v1254_v59, %v1254_v59 }
 0xeaf   :  { %v1261_v38 = vmul.f32 %v1259_v37, %v1254_v59 }
 0xeb1   :  { %v1263_v39 = vmul.f32 0.044715, %v1261_v38 }
 0xeb3   :  { %v1265_v40 = vadd.f32 %v1263_v39, %v1254_v59 }
 0xeb5   :  { %v1267_v41 = vmul.f32 0.7978846, %v1265_v40 }
 0xeb7   :  { %1564 = vtanh.f32 %v1267_v41 }
 0xeb8   :  { %v1256_v42 = vpop.f32.mrf.mxu3 }
 0xeb9   :  { %v1257_v43 = vadd.f32 %v1506_v35, %v1256_v42 }
 0xebb   :  { %v1260_v44 = vmul.f32 %v1257_v43, %v1257_v43 }
 0xebd   :  { %v1565_v45 = vpop.eup %1564  ;;  %v1262_v46 = vmul.f32 %v1260_v44, %v1257_v43 }
 0xebe   :  { %v1271_v47 = vadd.f32 1.0, %v1565_v45 }
 0xebf   :  { %v1264_v48 = vmul.f32 0.044715, %v1262_v46 }
 0xec0   :  { %v1273_v49 = vmul.f32 0.5, %v1271_v47 }
 0xec1   :  { %v1266_v50 = vadd.f32 %v1264_v48, %v1257_v43 }
 0xec2   :  { %v1275_v51 = vmul.f32 %v1273_v49, %v1254_v59 }
 0xec3   :  { %v1268_v52 = vmul.f32 0.7978846, %v1266_v50 }
 0xec4   :  { %1468 = vmatmul.msk.f32.vlgmr.msrb.gmra.mxu1 %vm722_vm2, %v1275_v51 }
 0xec5   :  { %1566 = vtanh.f32 %v1268_v52 }
 0xecb   :  { %v1567_v24 = vpop.eup %1566 }
 0xecc   :  { %v1272_v53 = vadd.f32 1.0, %v1567_v24 }
 0xece   :  { %v1274_v10 = vmul.f32 0.5, %v1272_v53 }
 0xed0   :  { %v1276_v55 = vmul.f32 %v1274_v10, %v1257_v43 }
 0xed2   :  { %1469 = vmatmul.msk.f32.gmra.mxu1 %vm722_vm2, %v1276_v55 }
 0xf41   :  { %v1314_v56 = vpop.f32.mrf.mxu1 }
 0xf42   :  { %v1315_v57 = vadd.f32 %v1507_v29, %v1314_v56 }
 0xf44   :  { %v1320_v58 = vadd.f32 %v1315_v57, %v1218_v15 }
 0xf46   :  { %v1326_v60 = vsel %vm174_vm0, %v1320_v58, 0.0 }
 0xf47   :  { %1327 = vadd.xlane.f32.xlu2 %v1326_v60 }
 0xf4f   :  { %v1317_v20 = vpop.f32.mrf.mxu1 }
 0xf50   :  { %v1318_v61 = vadd.f32 %v1507_v29, %v1317_v20 }
 0xf52   :  { %v1321_v62 = vadd.f32 %v1318_v61, %v1219_v26  ;;  %v1508_v26 = vld [vmem:[%s2276_s16 + $0x1] ss:$0 sm:$0xff]  ;;  %s1789_s16 = smov [#allocation15]  }
 0xf53   :  { %s1386_s18 = sshll.u32 %s1789_s16, 4  ;;  %s1387_s18 = int_to_ptr.vmem [resolvable:$true] %s1386_s18 }
 0xf54   :  { %v1329_v63 = vsel %vm174_vm0, %v1321_v62, 0.0 }
 0xf55   :  { %1330 = vadd.xlane.f32.xlu0 %v1329_v63 }
 0xfba   :  { %v1328_v1 = vpop.xlane.xlu2 %1327 }
 0xfbb   :  { %v1332_v2 = vmul.f32 %v1328_v1, %v1918_v17 }
 0xfbd   :  { %v1334_v3 = vsub.f32 %v1320_v58, %v1332_v2 }
 0xfbf   :  { %v1336_v4 = vmul.f32 %v1334_v3, %v1334_v3 }
 0xfc1   :  { %v1338_v0 = vsel %vm174_vm0, %v1336_v4, 0.0 }
 0xfc2   :  { %1339 = vadd.xlane.f32.xlu1 %v1338_v0 }
 0xfc8   :  { %v1331_v5 = vpop.xlane.xlu0 %1330 }
 0xfc9   :  { %v1333_v6 = vmul.f32 %v1331_v5, %v1918_v17 }
 0xfcb   :  { %v1335_v7 = vsub.f32 %v1321_v62, %v1333_v6 }
 0xfcd   :  { %v1337_v8 = vmul.f32 %v1335_v7, %v1335_v7 }
 0xfcf   :  { %v1341_v9 = vsel %vm174_vm0, %v1337_v8, 0.0 }
 0xfd0   :  { %1342 = vadd.xlane.f32.xlu2 %v1341_v9 }
0x1035   :  { %v1340_v11 = vpop.xlane.xlu1 %1339 }
0x1036   :  { %v1344_v12 = vmul.f32 %v1340_v11, %v1918_v17 }
0x1038   :  { %v1346_v13 = vadd.f32 1e-12, %v1344_v12 }
0x103a   :  { %1568 = vrsqrt.f32 %v1346_v13  ;;  %vm1354_vm1 = vweird.f32 %v1346_v13 }
0x1040   :  { %v1569_v14 = vpop.eup %1568 }
0x1041   :  { %v1349_v15 = vmul.f32 %v1569_v14, %v1346_v13  ;;  %vm1355_vm15 = vweird.f32 %v1569_v14 }
0x1042   :  { %vm1356_vm2 = vmor %vm1354_vm1, %vm1355_vm15 }
0x1043   :  { %v1350_v16 = vmul.f32 %v1569_v14, %v1349_v15  ;;  %v1343_v18 = vpop.xlane.xlu2 %1342 }
0x1044   :  { %v1345_v19 = vmul.f32 %v1343_v18, %v1918_v17 }
0x1045   :  { %v1351_v21 = vmul.f32 0.5, %v1350_v16 }
0x1046   :  { %v1347_v22 = vadd.f32 1e-12, %v1345_v19 }
0x1047   :  { %v1352_v23 = vsub.f32 1.5, %v1351_v21 }
0x1048   :  { %1570 = vrsqrt.f32 %v1347_v22  ;;  %vm1364_vm4 = vweird.f32 %v1347_v22 }
0x1049   :  { %v1353_v25 = vmul.f32 %v1569_v14, %v1352_v23 }
0x104b   :  { %v1357_v27 = vsel %vm1356_vm2, %v1569_v14, %v1353_v25 }
0x104c   :  { %v1368_v28 = vmul.f32 %v1357_v27, %v1334_v3 }
0x104e   :  { %v1571_v31 = vpop.eup %1570  ;;  %v1373_v32 = vmul.f32 %v1508_v26, %v1368_v28 }
0x104f   :  { %v1359_v33 = vmul.f32 %v1571_v31, %v1347_v22  ;;  %vm1365_vm3 = vweird.f32 %v1571_v31 }
0x1050   :  { %v1378_v54 = vadd.f32 %v1509_v30, %v1373_v32  ;;  %vm1366_vm5 = vmor %vm1364_vm4, %vm1365_vm3 }
0x1051   :  { %v1360_v17 = vmul.f32 %v1571_v31, %v1359_v33 }
0x1052   :  { %1380 = vst.msk [vmem:[#allocation15] sm:$0xff] %vm174_vm0, %v1378_v54 }
0x1053   :  { %v1361_v34 = vmul.f32 0.5, %v1360_v17 }
0x1055   :  { %v1362_v35 = vsub.f32 1.5, %v1361_v34 }
0x1057   :  { %v1363_v36 = vmul.f32 %v1571_v31, %v1362_v35 }
0x1059   :  { %v1367_v59 = vsel %vm1366_vm5, %v1571_v31, %v1363_v36 }
0x105a   :  { %v1369_v37 = vmul.f32 %v1367_v59, %v1335_v7 }
0x105c   :  { %v1374_v38 = vmul.f32 %v1508_v26, %v1369_v37 }
0x105e   :  { %v1379_v39 = vadd.f32 %v1509_v30, %v1374_v38 }
0x1060   :  { %1381 = vst.msk [vmem:[#allocation15 + $0x8] sm:$0xff] %vm174_vm0, %v1379_v39 }
0x1061   :  { %1394 = dma.vmem_to_hbm [thread:$0]  %s1387_s18, 256, %s1389_s21, [#allocation5], %s2291_s25, %s2291_s25, %s2290_s5  }
0x1062   :  { %1772 = dma.done.wait [#allocation5], 256  }
0x1063   :  { %1773 = vsyncadd [#allocation5], 4294967040 }
0x1064   :  { %1399 = vsyncpa [#allocation4], 1 }
0x1065   :  { %1400 = vsyncpa [#allocation7], 1 }
0x1066   :  { %1401 = vsyncpa [#allocation10], 1 }
0x1067   :  { %1402 = vsyncpa [#allocation13], 1 }
0x1068   :  { %1403 = vsyncpa [#allocation5], 1 }

</bundles_post_ra>
